<compile_context>
chip_gen: v6e
topology: v6e:2x2x1
jax: 0.10.0
libtpu: 0.0.40
codegen_flags: <defaults>
</compile_context>

<pallas_src>
import jax
import jax.numpy as jnp
from jax.experimental import pallas as pl
from jax.experimental.pallas import tpu as pltpu


def _sigmoid(x):
    # exp and the divide both land on the EUP slot (approximate HW reciprocal).
    return pl.reciprocal(1.0 + jnp.exp(-x), approx=True)


# -----------------------------------------------------------------------------
# Kernel: 2-layer LSTM recurrence (PyTorch gate order i,f,g,o), last hidden
# state -> fc -> sigmoid.  Everything resides in VMEM (shapes are tiny); the
# time loop is fully unrolled inside the kernel.
# -----------------------------------------------------------------------------
def _tft_kernel(x2d_ref,            # (S*B, D)  time-major: rows t*B:(t+1)*B = step t
                wih0_ref,           # (D, 4H)
                whh0_ref,           # (H, 4H)
                b0_ref,             # (1, 4H)   b_ih0 + b_hh0
                w1f_ref,            # (2H, 4H)  [W_ih1; W_hh1] stacked
                b1_ref,             # (1, 4H)   b_ih1 + b_hh1
                wfc_ref,            # (1, H)
                bfc_ref,            # (1, 1)
                o_ref):             # (B, 1)
    B = o_ref.shape[0]
    H = whh0_ref.shape[0]
    S = x2d_ref.shape[0] // B

    # ---- hoisted, time-invariant work --------------------------------------
    whh0 = whh0_ref[...]                                     # stays resident in vregs
    w1f = w1f_ref[...]
    b1b = jnp.broadcast_to(b1_ref[...], (B, 4 * H))          # broadcast ONCE

    # Layer-0 input projection for ALL timesteps in a single matmul.
    gates0_pre = (jnp.dot(x2d_ref[...], wih0_ref[...],
                          preferred_element_type=jnp.float32)
                  + b0_ref[...])                             # (S*B, 4H)

    def cell(gates, c):
        # Activate the whole 4H-wide gates tensor once per nonlinearity, then slice.
        sig = _sigmoid(gates)                                # i, f, o live here
        th = jnp.tanh(gates)                                 # g lives here
        i_g = sig[:, 0 * H:1 * H]
        f_g = sig[:, 1 * H:2 * H]
        g_g = th[:, 2 * H:3 * H]
        o_g = sig[:, 3 * H:4 * H]
        c_new = f_g * c + i_g * g_g
        h_new = o_g * jnp.tanh(c_new)
        return h_new, c_new

    # ---- recurrence: fully unrolled (short, fixed trip count) ---------------
    z = jnp.zeros((B, H), jnp.float32)
    h0, c0, h1, c1 = z, z, z, z
    for t in range(S):                                       # static unroll
        g0 = (gates0_pre[t * B:(t + 1) * B, :]
              + jnp.dot(h0, whh0, preferred_element_type=jnp.float32))
        h0, c0 = cell(g0, c0)
        g1 = (jnp.dot(jnp.concatenate([h0, h1], axis=1), w1f,
                      preferred_element_type=jnp.float32)
              + b1b)
        h1, c1 = cell(g1, c1)

    # ---- head: Linear(H, 1) + sigmoid as a VPU multiply + lane reduce -------
    logit = (jnp.sum(h1 * wfc_ref[...], axis=1, keepdims=True)
             + bfc_ref[...])                                 # (B, 1)
    o_ref[...] = _sigmoid(logit)


def tft_forward(x, params, hidden=32):
    """x: (batch, seq, in_dim) float32. Returns (batch, 1) float32."""
    B, S, D = x.shape
    H = hidden

    # Layout plumbing outside the kernel (all cheap, one-time):
    #   time-major 2D view of x so the hoisted input projection is one matmul,
    #   stacked layer-1 weight for the fused input+recurrent dot,
    #   fc weight as a row vector for the VPU reduction.
    x2d = jnp.transpose(x, (1, 0, 2)).reshape(S * B, D)
    w1f = jnp.concatenate([params["wih1"], params["whh1"]], axis=0)   # (2H, 4H)
    wfc_row = params["wfc"].reshape(1, H)

    vmem = pl.BlockSpec(memory_space=pltpu.MemorySpace.VMEM)
    out = pl.pallas_call(
        _tft_kernel,
        out_shape=jax.ShapeDtypeStruct((B, 1), jnp.float32),
        in_specs=[vmem] * 8,
        out_specs=vmem,
    )(x2d,
      params["wih0"], params["whh0"], params["b0"],
      w1f, params["b1"],
      wfc_row, params["bfc"])
    return out


# -----------------------------------------------------------------------------
# Deterministic parameter construction (PyTorch LSTM shapes, pre-transposed)
# -----------------------------------------------------------------------------
def make_params(key, in_dim, hidden):
    ks = jax.random.split(key, 10)
    H4 = 4 * hidden
    s = 0.1
    # PyTorch stores weight_ih_l0: (4H, in_dim); we keep transposed (in_dim, 4H).
    p = {
        "wih0": jax.random.normal(ks[0], (in_dim, H4), jnp.float32) * s,
        "whh0": jax.random.normal(ks[1], (hidden, H4), jnp.float32) * s,
        "b0":   (jax.random.normal(ks[2], (1, H4), jnp.float32) * s
                 + jax.random.normal(ks[3], (1, H4), jnp.float32) * s),  # b_ih+b_hh
        "wih1": jax.random.normal(ks[4], (hidden, H4), jnp.float32) * s,
        "whh1": jax.random.normal(ks[5], (hidden, H4), jnp.float32) * s,
        "b1":   (jax.random.normal(ks[6], (1, H4), jnp.float32) * s
                 + jax.random.normal(ks[7], (1, H4), jnp.float32) * s),
        "wfc":  jax.random.normal(ks[8], (hidden, 1), jnp.float32) * s,
        "bfc":  jax.random.normal(ks[9], (1, 1), jnp.float32) * s,
    }
    return p


# -----------------------------------------------------------------------------
# Pure-JAX reference (PyTorch LSTM semantics) for correctness check
# -----------------------------------------------------------------------------
def tft_reference(x, params, hidden=32):
    B, S, D = x.shape
    H = hidden

    def cell(inp, h, c, wih, whh, b):
        g = inp @ wih + h @ whh + b
        i = jax.nn.sigmoid(g[:, 0 * H:1 * H])
        f = jax.nn.sigmoid(g[:, 1 * H:2 * H])
        gg = jnp.tanh(g[:, 2 * H:3 * H])
        o = jax.nn.sigmoid(g[:, 3 * H:4 * H])
        c = f * c + i * gg
        h = o * jnp.tanh(c)
        return h, c

    h0 = jnp.zeros((B, H)); c0 = jnp.zeros((B, H))
    h1 = jnp.zeros((B, H)); c1 = jnp.zeros((B, H))
    for t in range(S):
        h0, c0 = cell(x[:, t, :], h0, c0, params["wih0"], params["whh0"], params["b0"])
        h1, c1 = cell(h0, h1, c1, params["wih1"], params["whh1"], params["b1"])
    return jax.nn.sigmoid(h1 @ params["wfc"] + params["bfc"])


if __name__ == "__main__":
    batch, seq, in_dim, hidden = 2, 8, 4, 32

    key = jax.random.PRNGKey(0)
    kx, kp = jax.random.split(key)
    x = jax.random.normal(kx, (batch, seq, in_dim), jnp.float32)
    params = make_params(kp, in_dim, hidden)

    out = tft_forward(x, params, hidden=hidden)
    out = jax.block_until_ready(out)

    ref = tft_reference(x, params, hidden=hidden)
    assert out.shape == (batch, 1)
    # Tolerance accounts for the approximate EUP reciprocal used in the in-kernel
    # sigmoid (pl.reciprocal(approx=True)); structural errors would be >> 5e-3.
    assert jnp.allclose(out, ref, atol=5e-3, rtol=5e-3), (out, ref)

    print("KERNEL_OK")
</pallas_src>

<mosaic_0001>
module attributes {stable_mosaic.version = 11 : i64} {
  func.func @_tft_kernel(%arg0: memref<16x4xf32, #tpu.memory_space<vmem>>, %arg1: memref<4x128xf32, #tpu.memory_space<vmem>>, %arg2: memref<32x128xf32, #tpu.memory_space<vmem>>, %arg3: memref<1x128xf32, #tpu.memory_space<vmem>>, %arg4: memref<64x128xf32, #tpu.memory_space<vmem>>, %arg5: memref<1x128xf32, #tpu.memory_space<vmem>>, %arg6: memref<1x32xf32, #tpu.memory_space<vmem>>, %arg7: memref<1x1xf32, #tpu.memory_space<vmem>>, %arg8: memref<2x1xf32, #tpu.memory_space<vmem>>) attributes {dimension_semantics = [], scalar_prefetch = 0 : i64, scratch_operands = 0 : i64, tpu.core_type = #tpu.core_type<tc>} {
    %c0 = arith.constant 0 : index
    %c0_0 = arith.constant 0 : index
    %0 = vector.load %arg2[%c0, %c0_0] : memref<32x128xf32, #tpu.memory_space<vmem>>, vector<32x128xf32>
    %c0_1 = arith.constant 0 : index
    %c0_2 = arith.constant 0 : index
    %1 = vector.load %arg4[%c0_1, %c0_2] : memref<64x128xf32, #tpu.memory_space<vmem>>, vector<64x128xf32>
    %c0_3 = arith.constant 0 : index
    %c0_4 = arith.constant 0 : index
    %2 = vector.load %arg5[%c0_3, %c0_4] : memref<1x128xf32, #tpu.memory_space<vmem>>, vector<1x128xf32>
    %3 = vector.shape_cast %2 : vector<1x128xf32> to vector<1x128xf32>
    %4 = vector.broadcast %3 : vector<1x128xf32> to vector<2x128xf32>
    %c0_5 = arith.constant 0 : index
    %c0_6 = arith.constant 0 : index
    %5 = vector.load %arg0[%c0_5, %c0_6] : memref<16x4xf32, #tpu.memory_space<vmem>>, vector<16x4xf32>
    %c0_7 = arith.constant 0 : index
    %c0_8 = arith.constant 0 : index
    %6 = vector.load %arg1[%c0_7, %c0_8] : memref<4x128xf32, #tpu.memory_space<vmem>>, vector<4x128xf32>
    %cst = arith.constant dense<0.000000e+00> : vector<16x128xf32>
    %7 = tpu.matmul %5, %6, %cst {dimension_numbers = #tpu.dot_dimension_numbers<[1], [0], [0], [1], [0, 0, 1, 1], [], []>} : vector<16x4xf32>, vector<4x128xf32>, vector<16x128xf32> -> vector<16x128xf32>
    %c0_9 = arith.constant 0 : index
    %c0_10 = arith.constant 0 : index
    %8 = vector.load %arg3[%c0_9, %c0_10] : memref<1x128xf32, #tpu.memory_space<vmem>>, vector<1x128xf32>
    %9 = vector.broadcast %8 : vector<1x128xf32> to vector<16x128xf32>
    %10 = arith.addf %7, %9 : vector<16x128xf32>
    %cst_11 = arith.constant 0.000000e+00 : f32
    %11 = vector.broadcast %cst_11 : f32 to vector<2x32xf32>
    %12 = vector.extract_strided_slice %10 {offsets = [0, 0], sizes = [2, 128], strides = [1, 1]} : vector<16x128xf32> to vector<2x128xf32>
    %cst_12 = arith.constant dense<0.000000e+00> : vector<2x128xf32>
    %13 = tpu.matmul %11, %0, %cst_12 {dimension_numbers = #tpu.dot_dimension_numbers<[1], [0], [0], [1], [0, 0, 1, 1], [], []>} : vector<2x32xf32>, vector<32x128xf32>, vector<2x128xf32> -> vector<2x128xf32>
    %14 = arith.addf %12, %13 : vector<2x128xf32>
    %cst_13 = arith.constant 0.000000e+00 : f32
    %15 = vector.broadcast %cst_13 : f32 to vector<2x128xf32>
    %16 = arith.subf %15, %14 : vector<2x128xf32>
    %17 = math.exp %16 : vector<2x128xf32>
    %cst_14 = arith.constant 1.000000e+00 : f32
    %18 = vector.broadcast %cst_14 : f32 to vector<2x128xf32>
    %19 = arith.addf %18, %17 : vector<2x128xf32>
    %20 = tpu.reciprocal %19 {approx = true} : vector<2x128xf32> -> vector<2x128xf32>
    %21 = math.tanh %14 : vector<2x128xf32>
    %22 = vector.extract_strided_slice %20 {offsets = [0, 0], sizes = [2, 32], strides = [1, 1]} : vector<2x128xf32> to vector<2x32xf32>
    %23 = vector.extract_strided_slice %20 {offsets = [0, 32], sizes = [2, 32], strides = [1, 1]} : vector<2x128xf32> to vector<2x32xf32>
    %24 = vector.extract_strided_slice %21 {offsets = [0, 64], sizes = [2, 32], strides = [1, 1]} : vector<2x128xf32> to vector<2x32xf32>
    %25 = vector.extract_strided_slice %20 {offsets = [0, 96], sizes = [2, 32], strides = [1, 1]} : vector<2x128xf32> to vector<2x32xf32>
    %26 = arith.mulf %23, %11 : vector<2x32xf32>
    %27 = arith.mulf %22, %24 : vector<2x32xf32>
    %28 = arith.addf %26, %27 : vector<2x32xf32>
    %29 = math.tanh %28 : vector<2x32xf32>
    %30 = arith.mulf %25, %29 : vector<2x32xf32>
    %31 = tpu.concatenate %30, %11 in 1 : vector<2x32xf32>, vector<2x32xf32> -> vector<2x64xf32>
    %cst_15 = arith.constant dense<0.000000e+00> : vector<2x128xf32>
    %32 = tpu.matmul %31, %1, %cst_15 {dimension_numbers = #tpu.dot_dimension_numbers<[1], [0], [0], [1], [0, 0, 1, 1], [], []>} : vector<2x64xf32>, vector<64x128xf32>, vector<2x128xf32> -> vector<2x128xf32>
    %33 = arith.addf %32, %4 : vector<2x128xf32>
    %cst_16 = arith.constant 0.000000e+00 : f32
    %34 = vector.broadcast %cst_16 : f32 to vector<2x128xf32>
    %35 = arith.subf %34, %33 : vector<2x128xf32>
    %36 = math.exp %35 : vector<2x128xf32>
    %cst_17 = arith.constant 1.000000e+00 : f32
    %37 = vector.broadcast %cst_17 : f32 to vector<2x128xf32>
    %38 = arith.addf %37, %36 : vector<2x128xf32>
    %39 = tpu.reciprocal %38 {approx = true} : vector<2x128xf32> -> vector<2x128xf32>
    %40 = math.tanh %33 : vector<2x128xf32>
    %41 = vector.extract_strided_slice %39 {offsets = [0, 0], sizes = [2, 32], strides = [1, 1]} : vector<2x128xf32> to vector<2x32xf32>
    %42 = vector.extract_strided_slice %39 {offsets = [0, 32], sizes = [2, 32], strides = [1, 1]} : vector<2x128xf32> to vector<2x32xf32>
    %43 = vector.extract_strided_slice %40 {offsets = [0, 64], sizes = [2, 32], strides = [1, 1]} : vector<2x128xf32> to vector<2x32xf32>
    %44 = vector.extract_strided_slice %39 {offsets = [0, 96], sizes = [2, 32], strides = [1, 1]} : vector<2x128xf32> to vector<2x32xf32>
    %45 = arith.mulf %42, %11 : vector<2x32xf32>
    %46 = arith.mulf %41, %43 : vector<2x32xf32>
    %47 = arith.addf %45, %46 : vector<2x32xf32>
    %48 = math.tanh %47 : vector<2x32xf32>
    %49 = arith.mulf %44, %48 : vector<2x32xf32>
    %50 = vector.extract_strided_slice %10 {offsets = [2, 0], sizes = [2, 128], strides = [1, 1]} : vector<16x128xf32> to vector<2x128xf32>
    %cst_18 = arith.constant dense<0.000000e+00> : vector<2x128xf32>
    %51 = tpu.matmul %30, %0, %cst_18 {dimension_numbers = #tpu.dot_dimension_numbers<[1], [0], [0], [1], [0, 0, 1, 1], [], []>} : vector<2x32xf32>, vector<32x128xf32>, vector<2x128xf32> -> vector<2x128xf32>
    %52 = arith.addf %50, %51 : vector<2x128xf32>
    %cst_19 = arith.constant 0.000000e+00 : f32
    %53 = vector.broadcast %cst_19 : f32 to vector<2x128xf32>
    %54 = arith.subf %53, %52 : vector<2x128xf32>
    %55 = math.exp %54 : vector<2x128xf32>
    %cst_20 = arith.constant 1.000000e+00 : f32
    %56 = vector.broadcast %cst_20 : f32 to vector<2x128xf32>
    %57 = arith.addf %56, %55 : vector<2x128xf32>
    %58 = tpu.reciprocal %57 {approx = true} : vector<2x128xf32> -> vector<2x128xf32>
    %59 = math.tanh %52 : vector<2x128xf32>
    %60 = vector.extract_strided_slice %58 {offsets = [0, 0], sizes = [2, 32], strides = [1, 1]} : vector<2x128xf32> to vector<2x32xf32>
    %61 = vector.extract_strided_slice %58 {offsets = [0, 32], sizes = [2, 32], strides = [1, 1]} : vector<2x128xf32> to vector<2x32xf32>
    %62 = vector.extract_strided_slice %59 {offsets = [0, 64], sizes = [2, 32], strides = [1, 1]} : vector<2x128xf32> to vector<2x32xf32>
    %63 = vector.extract_strided_slice %58 {offsets = [0, 96], sizes = [2, 32], strides = [1, 1]} : vector<2x128xf32> to vector<2x32xf32>
    %64 = arith.mulf %61, %28 : vector<2x32xf32>
    %65 = arith.mulf %60, %62 : vector<2x32xf32>
    %66 = arith.addf %64, %65 : vector<2x32xf32>
    %67 = math.tanh %66 : vector<2x32xf32>
    %68 = arith.mulf %63, %67 : vector<2x32xf32>
    %69 = tpu.concatenate %68, %49 in 1 : vector<2x32xf32>, vector<2x32xf32> -> vector<2x64xf32>
    %cst_21 = arith.constant dense<0.000000e+00> : vector<2x128xf32>
    %70 = tpu.matmul %69, %1, %cst_21 {dimension_numbers = #tpu.dot_dimension_numbers<[1], [0], [0], [1], [0, 0, 1, 1], [], []>} : vector<2x64xf32>, vector<64x128xf32>, vector<2x128xf32> -> vector<2x128xf32>
    %71 = arith.addf %70, %4 : vector<2x128xf32>
    %cst_22 = arith.constant 0.000000e+00 : f32
    %72 = vector.broadcast %cst_22 : f32 to vector<2x128xf32>
    %73 = arith.subf %72, %71 : vector<2x128xf32>
    %74 = math.exp %73 : vector<2x128xf32>
    %cst_23 = arith.constant 1.000000e+00 : f32
    %75 = vector.broadcast %cst_23 : f32 to vector<2x128xf32>
    %76 = arith.addf %75, %74 : vector<2x128xf32>
    %77 = tpu.reciprocal %76 {approx = true} : vector<2x128xf32> -> vector<2x128xf32>
    %78 = math.tanh %71 : vector<2x128xf32>
    %79 = vector.extract_strided_slice %77 {offsets = [0, 0], sizes = [2, 32], strides = [1, 1]} : vector<2x128xf32> to vector<2x32xf32>
    %80 = vector.extract_strided_slice %77 {offsets = [0, 32], sizes = [2, 32], strides = [1, 1]} : vector<2x128xf32> to vector<2x32xf32>
    %81 = vector.extract_strided_slice %78 {offsets = [0, 64], sizes = [2, 32], strides = [1, 1]} : vector<2x128xf32> to vector<2x32xf32>
    %82 = vector.extract_strided_slice %77 {offsets = [0, 96], sizes = [2, 32], strides = [1, 1]} : vector<2x128xf32> to vector<2x32xf32>
    %83 = arith.mulf %80, %47 : vector<2x32xf32>
    %84 = arith.mulf %79, %81 : vector<2x32xf32>
    %85 = arith.addf %83, %84 : vector<2x32xf32>
    %86 = math.tanh %85 : vector<2x32xf32>
    %87 = arith.mulf %82, %86 : vector<2x32xf32>
    %88 = vector.extract_strided_slice %10 {offsets = [4, 0], sizes = [2, 128], strides = [1, 1]} : vector<16x128xf32> to vector<2x128xf32>
    %cst_24 = arith.constant dense<0.000000e+00> : vector<2x128xf32>
    %89 = tpu.matmul %68, %0, %cst_24 {dimension_numbers = #tpu.dot_dimension_numbers<[1], [0], [0], [1], [0, 0, 1, 1], [], []>} : vector<2x32xf32>, vector<32x128xf32>, vector<2x128xf32> -> vector<2x128xf32>
    %90 = arith.addf %88, %89 : vector<2x128xf32>
    %cst_25 = arith.constant 0.000000e+00 : f32
    %91 = vector.broadcast %cst_25 : f32 to vector<2x128xf32>
    %92 = arith.subf %91, %90 : vector<2x128xf32>
    %93 = math.exp %92 : vector<2x128xf32>
    %cst_26 = arith.constant 1.000000e+00 : f32
    %94 = vector.broadcast %cst_26 : f32 to vector<2x128xf32>
    %95 = arith.addf %94, %93 : vector<2x128xf32>
    %96 = tpu.reciprocal %95 {approx = true} : vector<2x128xf32> -> vector<2x128xf32>
    %97 = math.tanh %90 : vector<2x128xf32>
    %98 = vector.extract_strided_slice %96 {offsets = [0, 0], sizes = [2, 32], strides = [1, 1]} : vector<2x128xf32> to vector<2x32xf32>
    %99 = vector.extract_strided_slice %96 {offsets = [0, 32], sizes = [2, 32], strides = [1, 1]} : vector<2x128xf32> to vector<2x32xf32>
    %100 = vector.extract_strided_slice %97 {offsets = [0, 64], sizes = [2, 32], strides = [1, 1]} : vector<2x128xf32> to vector<2x32xf32>
    %101 = vector.extract_strided_slice %96 {offsets = [0, 96], sizes = [2, 32], strides = [1, 1]} : vector<2x128xf32> to vector<2x32xf32>
    %102 = arith.mulf %99, %66 : vector<2x32xf32>
    %103 = arith.mulf %98, %100 : vector<2x32xf32>
    %104 = arith.addf %102, %103 : vector<2x32xf32>
    %105 = math.tanh %104 : vector<2x32xf32>
    %106 = arith.mulf %101, %105 : vector<2x32xf32>
    %107 = tpu.concatenate %106, %87 in 1 : vector<2x32xf32>, vector<2x32xf32> -> vector<2x64xf32>
    %cst_27 = arith.constant dense<0.000000e+00> : vector<2x128xf32>
    %108 = tpu.matmul %107, %1, %cst_27 {dimension_numbers = #tpu.dot_dimension_numbers<[1], [0], [0], [1], [0, 0, 1, 1], [], []>} : vector<2x64xf32>, vector<64x128xf32>, vector<2x128xf32> -> vector<2x128xf32>
    %109 = arith.addf %108, %4 : vector<2x128xf32>
    %cst_28 = arith.constant 0.000000e+00 : f32
    %110 = vector.broadcast %cst_28 : f32 to vector<2x128xf32>
    %111 = arith.subf %110, %109 : vector<2x128xf32>
    %112 = math.exp %111 : vector<2x128xf32>
    %cst_29 = arith.constant 1.000000e+00 : f32
    %113 = vector.broadcast %cst_29 : f32 to vector<2x128xf32>
    %114 = arith.addf %113, %112 : vector<2x128xf32>
    %115 = tpu.reciprocal %114 {approx = true} : vector<2x128xf32> -> vector<2x128xf32>
    %116 = math.tanh %109 : vector<2x128xf32>
    %117 = vector.extract_strided_slice %115 {offsets = [0, 0], sizes = [2, 32], strides = [1, 1]} : vector<2x128xf32> to vector<2x32xf32>
    %118 = vector.extract_strided_slice %115 {offsets = [0, 32], sizes = [2, 32], strides = [1, 1]} : vector<2x128xf32> to vector<2x32xf32>
    %119 = vector.extract_strided_slice %116 {offsets = [0, 64], sizes = [2, 32], strides = [1, 1]} : vector<2x128xf32> to vector<2x32xf32>
    %120 = vector.extract_strided_slice %115 {offsets = [0, 96], sizes = [2, 32], strides = [1, 1]} : vector<2x128xf32> to vector<2x32xf32>
    %121 = arith.mulf %118, %85 : vector<2x32xf32>
    %122 = arith.mulf %117, %119 : vector<2x32xf32>
    %123 = arith.addf %121, %122 : vector<2x32xf32>
    %124 = math.tanh %123 : vector<2x32xf32>
    %125 = arith.mulf %120, %124 : vector<2x32xf32>
    %126 = vector.extract_strided_slice %10 {offsets = [6, 0], sizes = [2, 128], strides = [1, 1]} : vector<16x128xf32> to vector<2x128xf32>
    %cst_30 = arith.constant dense<0.000000e+00> : vector<2x128xf32>
    %127 = tpu.matmul %106, %0, %cst_30 {dimension_numbers = #tpu.dot_dimension_numbers<[1], [0], [0], [1], [0, 0, 1, 1], [], []>} : vector<2x32xf32>, vector<32x128xf32>, vector<2x128xf32> -> vector<2x128xf32>
    %128 = arith.addf %126, %127 : vector<2x128xf32>
    %cst_31 = arith.constant 0.000000e+00 : f32
    %129 = vector.broadcast %cst_31 : f32 to vector<2x128xf32>
    %130 = arith.subf %129, %128 : vector<2x128xf32>
    %131 = math.exp %130 : vector<2x128xf32>
    %cst_32 = arith.constant 1.000000e+00 : f32
    %132 = vector.broadcast %cst_32 : f32 to vector<2x128xf32>
    %133 = arith.addf %132, %131 : vector<2x128xf32>
    %134 = tpu.reciprocal %133 {approx = true} : vector<2x128xf32> -> vector<2x128xf32>
    %135 = math.tanh %128 : vector<2x128xf32>
    %136 = vector.extract_strided_slice %134 {offsets = [0, 0], sizes = [2, 32], strides = [1, 1]} : vector<2x128xf32> to vector<2x32xf32>
    %137 = vector.extract_strided_slice %134 {offsets = [0, 32], sizes = [2, 32], strides = [1, 1]} : vector<2x128xf32> to vector<2x32xf32>
    %138 = vector.extract_strided_slice %135 {offsets = [0, 64], sizes = [2, 32], strides = [1, 1]} : vector<2x128xf32> to vector<2x32xf32>
    %139 = vector.extract_strided_slice %134 {offsets = [0, 96], sizes = [2, 32], strides = [1, 1]} : vector<2x128xf32> to vector<2x32xf32>
    %140 = arith.mulf %137, %104 : vector<2x32xf32>
    %141 = arith.mulf %136, %138 : vector<2x32xf32>
    %142 = arith.addf %140, %141 : vector<2x32xf32>
    %143 = math.tanh %142 : vector<2x32xf32>
    %144 = arith.mulf %139, %143 : vector<2x32xf32>
    %145 = tpu.concatenate %144, %125 in 1 : vector<2x32xf32>, vector<2x32xf32> -> vector<2x64xf32>
    %cst_33 = arith.constant dense<0.000000e+00> : vector<2x128xf32>
    %146 = tpu.matmul %145, %1, %cst_33 {dimension_numbers = #tpu.dot_dimension_numbers<[1], [0], [0], [1], [0, 0, 1, 1], [], []>} : vector<2x64xf32>, vector<64x128xf32>, vector<2x128xf32> -> vector<2x128xf32>
    %147 = arith.addf %146, %4 : vector<2x128xf32>
    %cst_34 = arith.constant 0.000000e+00 : f32
    %148 = vector.broadcast %cst_34 : f32 to vector<2x128xf32>
    %149 = arith.subf %148, %147 : vector<2x128xf32>
    %150 = math.exp %149 : vector<2x128xf32>
    %cst_35 = arith.constant 1.000000e+00 : f32
    %151 = vector.broadcast %cst_35 : f32 to vector<2x128xf32>
    %152 = arith.addf %151, %150 : vector<2x128xf32>
    %153 = tpu.reciprocal %152 {approx = true} : vector<2x128xf32> -> vector<2x128xf32>
    %154 = math.tanh %147 : vector<2x128xf32>
    %155 = vector.extract_strided_slice %153 {offsets = [0, 0], sizes = [2, 32], strides = [1, 1]} : vector<2x128xf32> to vector<2x32xf32>
    %156 = vector.extract_strided_slice %153 {offsets = [0, 32], sizes = [2, 32], strides = [1, 1]} : vector<2x128xf32> to vector<2x32xf32>
    %157 = vector.extract_strided_slice %154 {offsets = [0, 64], sizes = [2, 32], strides = [1, 1]} : vector<2x128xf32> to vector<2x32xf32>
    %158 = vector.extract_strided_slice %153 {offsets = [0, 96], sizes = [2, 32], strides = [1, 1]} : vector<2x128xf32> to vector<2x32xf32>
    %159 = arith.mulf %156, %123 : vector<2x32xf32>
    %160 = arith.mulf %155, %157 : vector<2x32xf32>
    %161 = arith.addf %159, %160 : vector<2x32xf32>
    %162 = math.tanh %161 : vector<2x32xf32>
    %163 = arith.mulf %158, %162 : vector<2x32xf32>
    %164 = vector.extract_strided_slice %10 {offsets = [8, 0], sizes = [2, 128], strides = [1, 1]} : vector<16x128xf32> to vector<2x128xf32>
    %cst_36 = arith.constant dense<0.000000e+00> : vector<2x128xf32>
    %165 = tpu.matmul %144, %0, %cst_36 {dimension_numbers = #tpu.dot_dimension_numbers<[1], [0], [0], [1], [0, 0, 1, 1], [], []>} : vector<2x32xf32>, vector<32x128xf32>, vector<2x128xf32> -> vector<2x128xf32>
    %166 = arith.addf %164, %165 : vector<2x128xf32>
    %cst_37 = arith.constant 0.000000e+00 : f32
    %167 = vector.broadcast %cst_37 : f32 to vector<2x128xf32>
    %168 = arith.subf %167, %166 : vector<2x128xf32>
    %169 = math.exp %168 : vector<2x128xf32>
    %cst_38 = arith.constant 1.000000e+00 : f32
    %170 = vector.broadcast %cst_38 : f32 to vector<2x128xf32>
    %171 = arith.addf %170, %169 : vector<2x128xf32>
    %172 = tpu.reciprocal %171 {approx = true} : vector<2x128xf32> -> vector<2x128xf32>
    %173 = math.tanh %166 : vector<2x128xf32>
    %174 = vector.extract_strided_slice %172 {offsets = [0, 0], sizes = [2, 32], strides = [1, 1]} : vector<2x128xf32> to vector<2x32xf32>
    %175 = vector.extract_strided_slice %172 {offsets = [0, 32], sizes = [2, 32], strides = [1, 1]} : vector<2x128xf32> to vector<2x32xf32>
    %176 = vector.extract_strided_slice %173 {offsets = [0, 64], sizes = [2, 32], strides = [1, 1]} : vector<2x128xf32> to vector<2x32xf32>
    %177 = vector.extract_strided_slice %172 {offsets = [0, 96], sizes = [2, 32], strides = [1, 1]} : vector<2x128xf32> to vector<2x32xf32>
    %178 = arith.mulf %175, %142 : vector<2x32xf32>
    %179 = arith.mulf %174, %176 : vector<2x32xf32>
    %180 = arith.addf %178, %179 : vector<2x32xf32>
    %181 = math.tanh %180 : vector<2x32xf32>
    %182 = arith.mulf %177, %181 : vector<2x32xf32>
    %183 = tpu.concatenate %182, %163 in 1 : vector<2x32xf32>, vector<2x32xf32> -> vector<2x64xf32>
    %cst_39 = arith.constant dense<0.000000e+00> : vector<2x128xf32>
    %184 = tpu.matmul %183, %1, %cst_39 {dimension_numbers = #tpu.dot_dimension_numbers<[1], [0], [0], [1], [0, 0, 1, 1], [], []>} : vector<2x64xf32>, vector<64x128xf32>, vector<2x128xf32> -> vector<2x128xf32>
    %185 = arith.addf %184, %4 : vector<2x128xf32>
    %cst_40 = arith.constant 0.000000e+00 : f32
    %186 = vector.broadcast %cst_40 : f32 to vector<2x128xf32>
    %187 = arith.subf %186, %185 : vector<2x128xf32>
    %188 = math.exp %187 : vector<2x128xf32>
    %cst_41 = arith.constant 1.000000e+00 : f32
    %189 = vector.broadcast %cst_41 : f32 to vector<2x128xf32>
    %190 = arith.addf %189, %188 : vector<2x128xf32>
    %191 = tpu.reciprocal %190 {approx = true} : vector<2x128xf32> -> vector<2x128xf32>
    %192 = math.tanh %185 : vector<2x128xf32>
    %193 = vector.extract_strided_slice %191 {offsets = [0, 0], sizes = [2, 32], strides = [1, 1]} : vector<2x128xf32> to vector<2x32xf32>
    %194 = vector.extract_strided_slice %191 {offsets = [0, 32], sizes = [2, 32], strides = [1, 1]} : vector<2x128xf32> to vector<2x32xf32>
    %195 = vector.extract_strided_slice %192 {offsets = [0, 64], sizes = [2, 32], strides = [1, 1]} : vector<2x128xf32> to vector<2x32xf32>
    %196 = vector.extract_strided_slice %191 {offsets = [0, 96], sizes = [2, 32], strides = [1, 1]} : vector<2x128xf32> to vector<2x32xf32>
    %197 = arith.mulf %194, %161 : vector<2x32xf32>
    %198 = arith.mulf %193, %195 : vector<2x32xf32>
    %199 = arith.addf %197, %198 : vector<2x32xf32>
    %200 = math.tanh %199 : vector<2x32xf32>
    %201 = arith.mulf %196, %200 : vector<2x32xf32>
    %202 = vector.extract_strided_slice %10 {offsets = [10, 0], sizes = [2, 128], strides = [1, 1]} : vector<16x128xf32> to vector<2x128xf32>
    %cst_42 = arith.constant dense<0.000000e+00> : vector<2x128xf32>
    %203 = tpu.matmul %182, %0, %cst_42 {dimension_numbers = #tpu.dot_dimension_numbers<[1], [0], [0], [1], [0, 0, 1, 1], [], []>} : vector<2x32xf32>, vector<32x128xf32>, vector<2x128xf32> -> vector<2x128xf32>
    %204 = arith.addf %202, %203 : vector<2x128xf32>
    %cst_43 = arith.constant 0.000000e+00 : f32
    %205 = vector.broadcast %cst_43 : f32 to vector<2x128xf32>
    %206 = arith.subf %205, %204 : vector<2x128xf32>
    %207 = math.exp %206 : vector<2x128xf32>
    %cst_44 = arith.constant 1.000000e+00 : f32
    %208 = vector.broadcast %cst_44 : f32 to vector<2x128xf32>
    %209 = arith.addf %208, %207 : vector<2x128xf32>
    %210 = tpu.reciprocal %209 {approx = true} : vector<2x128xf32> -> vector<2x128xf32>
    %211 = math.tanh %204 : vector<2x128xf32>
    %212 = vector.extract_strided_slice %210 {offsets = [0, 0], sizes = [2, 32], strides = [1, 1]} : vector<2x128xf32> to vector<2x32xf32>
    %213 = vector.extract_strided_slice %210 {offsets = [0, 32], sizes = [2, 32], strides = [1, 1]} : vector<2x128xf32> to vector<2x32xf32>
    %214 = vector.extract_strided_slice %211 {offsets = [0, 64], sizes = [2, 32], strides = [1, 1]} : vector<2x128xf32> to vector<2x32xf32>
    %215 = vector.extract_strided_slice %210 {offsets = [0, 96], sizes = [2, 32], strides = [1, 1]} : vector<2x128xf32> to vector<2x32xf32>
    %216 = arith.mulf %213, %180 : vector<2x32xf32>
    %217 = arith.mulf %212, %214 : vector<2x32xf32>
    %218 = arith.addf %216, %217 : vector<2x32xf32>
    %219 = math.tanh %218 : vector<2x32xf32>
    %220 = arith.mulf %215, %219 : vector<2x32xf32>
    %221 = tpu.concatenate %220, %201 in 1 : vector<2x32xf32>, vector<2x32xf32> -> vector<2x64xf32>
    %cst_45 = arith.constant dense<0.000000e+00> : vector<2x128xf32>
    %222 = tpu.matmul %221, %1, %cst_45 {dimension_numbers = #tpu.dot_dimension_numbers<[1], [0], [0], [1], [0, 0, 1, 1], [], []>} : vector<2x64xf32>, vector<64x128xf32>, vector<2x128xf32> -> vector<2x128xf32>
    %223 = arith.addf %222, %4 : vector<2x128xf32>
    %cst_46 = arith.constant 0.000000e+00 : f32
    %224 = vector.broadcast %cst_46 : f32 to vector<2x128xf32>
    %225 = arith.subf %224, %223 : vector<2x128xf32>
    %226 = math.exp %225 : vector<2x128xf32>
    %cst_47 = arith.constant 1.000000e+00 : f32
    %227 = vector.broadcast %cst_47 : f32 to vector<2x128xf32>
    %228 = arith.addf %227, %226 : vector<2x128xf32>
    %229 = tpu.reciprocal %228 {approx = true} : vector<2x128xf32> -> vector<2x128xf32>
    %230 = math.tanh %223 : vector<2x128xf32>
    %231 = vector.extract_strided_slice %229 {offsets = [0, 0], sizes = [2, 32], strides = [1, 1]} : vector<2x128xf32> to vector<2x32xf32>
    %232 = vector.extract_strided_slice %229 {offsets = [0, 32], sizes = [2, 32], strides = [1, 1]} : vector<2x128xf32> to vector<2x32xf32>
    %233 = vector.extract_strided_slice %230 {offsets = [0, 64], sizes = [2, 32], strides = [1, 1]} : vector<2x128xf32> to vector<2x32xf32>
    %234 = vector.extract_strided_slice %229 {offsets = [0, 96], sizes = [2, 32], strides = [1, 1]} : vector<2x128xf32> to vector<2x32xf32>
    %235 = arith.mulf %232, %199 : vector<2x32xf32>
    %236 = arith.mulf %231, %233 : vector<2x32xf32>
    %237 = arith.addf %235, %236 : vector<2x32xf32>
    %238 = math.tanh %237 : vector<2x32xf32>
    %239 = arith.mulf %234, %238 : vector<2x32xf32>
    %240 = vector.extract_strided_slice %10 {offsets = [12, 0], sizes = [2, 128], strides = [1, 1]} : vector<16x128xf32> to vector<2x128xf32>
    %cst_48 = arith.constant dense<0.000000e+00> : vector<2x128xf32>
    %241 = tpu.matmul %220, %0, %cst_48 {dimension_numbers = #tpu.dot_dimension_numbers<[1], [0], [0], [1], [0, 0, 1, 1], [], []>} : vector<2x32xf32>, vector<32x128xf32>, vector<2x128xf32> -> vector<2x128xf32>
    %242 = arith.addf %240, %241 : vector<2x128xf32>
    %cst_49 = arith.constant 0.000000e+00 : f32
    %243 = vector.broadcast %cst_49 : f32 to vector<2x128xf32>
    %244 = arith.subf %243, %242 : vector<2x128xf32>
    %245 = math.exp %244 : vector<2x128xf32>
    %cst_50 = arith.constant 1.000000e+00 : f32
    %246 = vector.broadcast %cst_50 : f32 to vector<2x128xf32>
    %247 = arith.addf %246, %245 : vector<2x128xf32>
    %248 = tpu.reciprocal %247 {approx = true} : vector<2x128xf32> -> vector<2x128xf32>
    %249 = math.tanh %242 : vector<2x128xf32>
    %250 = vector.extract_strided_slice %248 {offsets = [0, 0], sizes = [2, 32], strides = [1, 1]} : vector<2x128xf32> to vector<2x32xf32>
    %251 = vector.extract_strided_slice %248 {offsets = [0, 32], sizes = [2, 32], strides = [1, 1]} : vector<2x128xf32> to vector<2x32xf32>
    %252 = vector.extract_strided_slice %249 {offsets = [0, 64], sizes = [2, 32], strides = [1, 1]} : vector<2x128xf32> to vector<2x32xf32>
    %253 = vector.extract_strided_slice %248 {offsets = [0, 96], sizes = [2, 32], strides = [1, 1]} : vector<2x128xf32> to vector<2x32xf32>
    %254 = arith.mulf %251, %218 : vector<2x32xf32>
    %255 = arith.mulf %250, %252 : vector<2x32xf32>
    %256 = arith.addf %254, %255 : vector<2x32xf32>
    %257 = math.tanh %256 : vector<2x32xf32>
    %258 = arith.mulf %253, %257 : vector<2x32xf32>
    %259 = tpu.concatenate %258, %239 in 1 : vector<2x32xf32>, vector<2x32xf32> -> vector<2x64xf32>
    %cst_51 = arith.constant dense<0.000000e+00> : vector<2x128xf32>
    %260 = tpu.matmul %259, %1, %cst_51 {dimension_numbers = #tpu.dot_dimension_numbers<[1], [0], [0], [1], [0, 0, 1, 1], [], []>} : vector<2x64xf32>, vector<64x128xf32>, vector<2x128xf32> -> vector<2x128xf32>
    %261 = arith.addf %260, %4 : vector<2x128xf32>
    %cst_52 = arith.constant 0.000000e+00 : f32
    %262 = vector.broadcast %cst_52 : f32 to vector<2x128xf32>
    %263 = arith.subf %262, %261 : vector<2x128xf32>
    %264 = math.exp %263 : vector<2x128xf32>
    %cst_53 = arith.constant 1.000000e+00 : f32
    %265 = vector.broadcast %cst_53 : f32 to vector<2x128xf32>
    %266 = arith.addf %265, %264 : vector<2x128xf32>
    %267 = tpu.reciprocal %266 {approx = true} : vector<2x128xf32> -> vector<2x128xf32>
    %268 = math.tanh %261 : vector<2x128xf32>
    %269 = vector.extract_strided_slice %267 {offsets = [0, 0], sizes = [2, 32], strides = [1, 1]} : vector<2x128xf32> to vector<2x32xf32>
    %270 = vector.extract_strided_slice %267 {offsets = [0, 32], sizes = [2, 32], strides = [1, 1]} : vector<2x128xf32> to vector<2x32xf32>
    %271 = vector.extract_strided_slice %268 {offsets = [0, 64], sizes = [2, 32], strides = [1, 1]} : vector<2x128xf32> to vector<2x32xf32>
    %272 = vector.extract_strided_slice %267 {offsets = [0, 96], sizes = [2, 32], strides = [1, 1]} : vector<2x128xf32> to vector<2x32xf32>
    %273 = arith.mulf %270, %237 : vector<2x32xf32>
    %274 = arith.mulf %269, %271 : vector<2x32xf32>
    %275 = arith.addf %273, %274 : vector<2x32xf32>
    %276 = math.tanh %275 : vector<2x32xf32>
    %277 = arith.mulf %272, %276 : vector<2x32xf32>
    %278 = vector.extract_strided_slice %10 {offsets = [14, 0], sizes = [2, 128], strides = [1, 1]} : vector<16x128xf32> to vector<2x128xf32>
    %cst_54 = arith.constant dense<0.000000e+00> : vector<2x128xf32>
    %279 = tpu.matmul %258, %0, %cst_54 {dimension_numbers = #tpu.dot_dimension_numbers<[1], [0], [0], [1], [0, 0, 1, 1], [], []>} : vector<2x32xf32>, vector<32x128xf32>, vector<2x128xf32> -> vector<2x128xf32>
    %280 = arith.addf %278, %279 : vector<2x128xf32>
    %cst_55 = arith.constant 0.000000e+00 : f32
    %281 = vector.broadcast %cst_55 : f32 to vector<2x128xf32>
    %282 = arith.subf %281, %280 : vector<2x128xf32>
    %283 = math.exp %282 : vector<2x128xf32>
    %cst_56 = arith.constant 1.000000e+00 : f32
    %284 = vector.broadcast %cst_56 : f32 to vector<2x128xf32>
    %285 = arith.addf %284, %283 : vector<2x128xf32>
    %286 = tpu.reciprocal %285 {approx = true} : vector<2x128xf32> -> vector<2x128xf32>
    %287 = math.tanh %280 : vector<2x128xf32>
    %288 = vector.extract_strided_slice %286 {offsets = [0, 0], sizes = [2, 32], strides = [1, 1]} : vector<2x128xf32> to vector<2x32xf32>
    %289 = vector.extract_strided_slice %286 {offsets = [0, 32], sizes = [2, 32], strides = [1, 1]} : vector<2x128xf32> to vector<2x32xf32>
    %290 = vector.extract_strided_slice %287 {offsets = [0, 64], sizes = [2, 32], strides = [1, 1]} : vector<2x128xf32> to vector<2x32xf32>
    %291 = vector.extract_strided_slice %286 {offsets = [0, 96], sizes = [2, 32], strides = [1, 1]} : vector<2x128xf32> to vector<2x32xf32>
    %292 = arith.mulf %289, %256 : vector<2x32xf32>
    %293 = arith.mulf %288, %290 : vector<2x32xf32>
    %294 = arith.addf %292, %293 : vector<2x32xf32>
    %295 = math.tanh %294 : vector<2x32xf32>
    %296 = arith.mulf %291, %295 : vector<2x32xf32>
    %297 = tpu.concatenate %296, %277 in 1 : vector<2x32xf32>, vector<2x32xf32> -> vector<2x64xf32>
    %cst_57 = arith.constant dense<0.000000e+00> : vector<2x128xf32>
    %298 = tpu.matmul %297, %1, %cst_57 {dimension_numbers = #tpu.dot_dimension_numbers<[1], [0], [0], [1], [0, 0, 1, 1], [], []>} : vector<2x64xf32>, vector<64x128xf32>, vector<2x128xf32> -> vector<2x128xf32>
    %299 = arith.addf %298, %4 : vector<2x128xf32>
    %cst_58 = arith.constant 0.000000e+00 : f32
    %300 = vector.broadcast %cst_58 : f32 to vector<2x128xf32>
    %301 = arith.subf %300, %299 : vector<2x128xf32>
    %302 = math.exp %301 : vector<2x128xf32>
    %cst_59 = arith.constant 1.000000e+00 : f32
    %303 = vector.broadcast %cst_59 : f32 to vector<2x128xf32>
    %304 = arith.addf %303, %302 : vector<2x128xf32>
    %305 = tpu.reciprocal %304 {approx = true} : vector<2x128xf32> -> vector<2x128xf32>
    %306 = math.tanh %299 : vector<2x128xf32>
    %307 = vector.extract_strided_slice %305 {offsets = [0, 0], sizes = [2, 32], strides = [1, 1]} : vector<2x128xf32> to vector<2x32xf32>
    %308 = vector.extract_strided_slice %305 {offsets = [0, 32], sizes = [2, 32], strides = [1, 1]} : vector<2x128xf32> to vector<2x32xf32>
    %309 = vector.extract_strided_slice %306 {offsets = [0, 64], sizes = [2, 32], strides = [1, 1]} : vector<2x128xf32> to vector<2x32xf32>
    %310 = vector.extract_strided_slice %305 {offsets = [0, 96], sizes = [2, 32], strides = [1, 1]} : vector<2x128xf32> to vector<2x32xf32>
    %311 = arith.mulf %308, %275 : vector<2x32xf32>
    %312 = arith.mulf %307, %309 : vector<2x32xf32>
    %313 = arith.addf %311, %312 : vector<2x32xf32>
    %314 = math.tanh %313 : vector<2x32xf32>
    %315 = arith.mulf %310, %314 : vector<2x32xf32>
    %c0_60 = arith.constant 0 : index
    %c0_61 = arith.constant 0 : index
    %316 = vector.load %arg6[%c0_60, %c0_61] : memref<1x32xf32, #tpu.memory_space<vmem>>, vector<1x32xf32>
    %317 = vector.broadcast %316 : vector<1x32xf32> to vector<2x32xf32>
    %318 = arith.mulf %315, %317 : vector<2x32xf32>
    %cst_62 = arith.constant dense<0.000000e+00> : vector<2xf32>
    %319 = vector.multi_reduction <add>, %318, %cst_62 [1] : vector<2x32xf32> to vector<2xf32>
    %320 = vector.shape_cast %319 : vector<2xf32> to vector<2x1xf32>
    %c0_63 = arith.constant 0 : index
    %c0_64 = arith.constant 0 : index
    %321 = vector.load %arg7[%c0_63, %c0_64] : memref<1x1xf32, #tpu.memory_space<vmem>>, vector<1x1xf32>
    %322 = vector.broadcast %321 : vector<1x1xf32> to vector<2x1xf32>
    %323 = arith.addf %320, %322 : vector<2x1xf32>
    %cst_65 = arith.constant 0.000000e+00 : f32
    %324 = vector.broadcast %cst_65 : f32 to vector<2x1xf32>
    %325 = arith.subf %324, %323 : vector<2x1xf32>
    %326 = math.exp %325 : vector<2x1xf32>
    %cst_66 = arith.constant 1.000000e+00 : f32
    %327 = vector.broadcast %cst_66 : f32 to vector<2x1xf32>
    %328 = arith.addf %327, %326 : vector<2x1xf32>
    %329 = tpu.reciprocal %328 {approx = true} : vector<2x1xf32> -> vector<2x1xf32>
    %c0_67 = arith.constant 0 : index
    %c0_68 = arith.constant 0 : index
    %330 = vector.load %arg8[%c0_67, %c0_68] : memref<2x1xf32, #tpu.memory_space<vmem>>, vector<2x1xf32>
    tpu.vector_store %arg8[%c0_67, %c0_68], %329 {strides = array<i32>} : memref<2x1xf32, #tpu.memory_space<vmem>>, vector<2x1xf32>,
    return
  }
}

</mosaic_0001>

<bundles_post_ra>
// kernel: tpu_custom_call.1
= control target key start
LH: loop header
LB: loop body
LE: loop exit
PB: predicated region body
PF: predicated region fallthrough
CT: control target
= control target key end

     0   :  { %s2954_s0 = inlined_call_operand.vmem [shape: f32[16,4], index: 0, kind: input, shape index: {}]   ;;  %s2955_s1 = inlined_call_operand.vmem [shape: f32[4,128], index: 1, kind: input, shape index: {}]   ;;  %s2956_s2 = inlined_call_operand.hbm [shape: f32[32,128], index: 2, kind: input, shape index: {}]   ;;  %s2957_s3 = inlined_call_operand.vmem [shape: f32[1,128], index: 3, kind: input, shape index: {}]   ;;  %s2958_s4 = inlined_call_operand.hbm [shape: f32[64,128], index: 4, kind: input, shape index: {}]   ;;  %s2959_s5 = inlined_call_operand.vmem [shape: f32[1,128], index: 5, kind: input, shape index: {}]   ;;  %s2960_s6 = inlined_call_operand.vmem [shape: f32[1,32], index: 6, kind: input, shape index: {}]   ;;  %s2961_s7 = inlined_call_operand.<no memory space> [shape: f32[1,1], index: 7, kind: input, shape index: {}]   ;;  %s2962_s8 = inlined_call_operand.vmem [shape: f32[2,1], index: 8, kind: output, shape index: {}]  }
   0x1   :  { %v13_v0 = vstv %s2961_s7 }
   0x2   :  { %14 = vst [vmem:[#allocation2] sm:$0x1] %v13_v0 }
   0x3   :  { %15 = vsyncpa [#allocation4], 0 }
   0x4   :  { %16 = vsyncpa [#allocation6], 0  ;;  %s2466_s29 = smov [#allocation3]  }
   0x5   :  { %s26_s30 = sshll.u32 %s2466_s29, 4  ;;  %s27_s30 = int_to_ptr.vmem [resolvable:$true] %s26_s30 }
   0x6   :  { %s2430_s9 = scalar_lea.vmem %s27_s30, 512  ;;  %p2435_p1 = scmp.lt.s32.totalorder %s27_s30, %s27_s30 }
   0x7   :  { %p2431_p0 = scmp.ne.s32.totalorder %s27_s30, %s2430_s9  ;;  %p2436_p2 = scmp.lt.s32.totalorder %s2430_s9, %s2430_s9 }
   0x9   :  { %p2437_p3 = por %p2436_p2, %p2435_p1 }
   0xb   :  { %p2438_p4 = pnand %p2437_p3, %p2431_p0 }
   0xd   :  { %2441 = shalt.err (!%p2438_p4)
}
   0xe   :  { %s2467_s10 = smov 128   ;;  %s2468_s11 = smov 8  }
   0xf   :  { %32 = dma.hbm_to_vmem [thread:$0]  %s2956_s2, 512, %s27_s30, [#allocation4], %s2467_s10, %s2467_s10, %s2468_s11  }
  0x10   :  { %s2469_s7 = smov [#allocation5]  }
  0x11   :  { %s40_s14 = sshll.u32 %s2469_s7, 4  ;;  %s41_s14 = int_to_ptr.vmem [resolvable:$true] %s40_s14 }
  0x12   :  { %s2450_s15 = scalar_lea.vmem %s41_s14, 1024  ;;  %p2455_p6 = scmp.lt.s32.totalorder %s41_s14, %s41_s14 }
  0x13   :  { %p2451_p5 = scmp.ne.s32.totalorder %s41_s14, %s2450_s15  ;;  %p2456_p7 = scmp.lt.s32.totalorder %s2450_s15, %s2450_s15 }
  0x15   :  { %p2457_p8 = por %p2456_p7, %p2455_p6 }
  0x17   :  { %p2458_p9 = pnand %p2457_p8, %p2451_p5 }
  0x19   :  { %2461 = shalt.err (!%p2458_p9)
}
  0x1a   :  { %46 = dma.hbm_to_vmem [thread:$0]  %s2958_s4, 1024, %s41_s14, [#allocation6], %s2467_s10, %s2467_s10, %s2468_s11  }
  0x1b   :  { %2462 = dma.done.wait [#allocation4], 512  }
  0x1c   :  { %2463 = vsyncadd [#allocation4], 4294966784 }
  0x1d   :  { %2464 = dma.done.wait [#allocation6], 1024  }
  0x1e   :  { %2465 = vsyncadd [#allocation6], 4294966272  ;;  %v2470_v1 = vmov 0.0   ;;  %vm2471_vm0 = vmmov 0   ;;  %vm95_vm1 = vcmask 1043456   ;;  %vm88_vm2 = vcmask 31744  }
  0x1f   :  { %2058 = vmatprep.subr.mxu1 %v2470_v1  ;;  %2066 = vmatprep.mubr.msk.f32.mxu1 %vm2471_vm0, %v2470_v1  ;;  %v80_v2 = vld [vmem:[%s2955_s1] sm:$0xf]  ;;  %v79_v4 = vld [vmem:[%s2954_s0 + $0x8] sm:$0xff]  ;;  %v2545_v6 = vld [vmem:[#allocation3 + $0x10] sm:$0xff]  ;;  %s2472_s22 = smov 64   ;;  %vm174_vm3 = vcmask 261120  }
  0x20   :  { %v78_v3 = vld [vmem:[%s2954_s0] sm:$0xff]  ;;  %2023 = vmatprep.subr.msk.mxu0 %vm95_vm1, %v80_v2  ;;  %v2551_v7 = vld [vmem:[#allocation3 + $0x8] sm:$0xff]  ;;  %v2586_v29 = vld [vmem:[#allocation5 + $0x30] sm:$0xff]  ;;  %vm277_vm4 = vcmask 523264   ;;  %s2474_s28 = smov 96   ;;  %vm1861_vm5 = vcmask 254976  }
  0x21   :  { %2025 = vmatprep.mubr.msk.f32.mxu0 %vm88_vm2, %v78_v3  ;;  %v2541_v5 = vld [vmem:[#allocation3 + $0x18] sm:$0xff]  ;;  %2024 = vmatpush3.msk.msra.mxu0 %vm95_vm1, %v80_v2  ;;  %v2557_v8 = vld [vmem:[#allocation3] sm:$0xff]  ;;  %v2590_v30 = vld [vmem:[#allocation5 + $0x28] sm:$0xff]  ;;  %vm1878_vm6 = vcmask 1024  }
  0x22   :  { %2059 = vmatpush3.msra.mxu1 %v2541_v5  ;;  %2026 = vmatmul.mubr.msk.f32.vlgmr.msra.gmra.mxu0 %vm88_vm2, %v79_v4  ;;  %v1887_v9 = vld [vmem:[%s2957_s3] ss:$0 sm:$0xff]  ;;  %s2473_s3 = smov 32   ;;  %v2594_v31 = vld [vmem:[#allocation5 + $0x20] sm:$0xff]  ;;  %v2602_v33 = vld [vmem:[#allocation5 + $0x10] sm:$0xff] }
  0x23   :  { %2028 = vmatprep.subr.mxu0 %v2470_v1  ;;  %2036 = vmatprep.mubr.msk.f32.mxu0 %vm2471_vm0, %v2470_v1  ;;  %v2584_v28 = vld [vmem:[#allocation5 + $0x38] sm:$0xff]  ;;  %v2606_v35 = vld [vmem:[#allocation5 + $0x8] sm:$0xff]  ;;  %v2613_v36 = vld [vmem:[#allocation5] sm:$0xff] }
  0x24   :  { %2029 = vmatpush3.msra.mxu0 %v2541_v5  ;;  %2060 = vmatprep.subr.mxu1 %v2470_v1  ;;  %v2598_v32 = vld [vmem:[#allocation5 + $0x18] sm:$0xff] }
  0x25   :  { %2030 = vmatprep.subr.mxu0 %v2470_v1  ;;  %2061 = vmatpush3.msra.mxu1 %v2545_v6  ;;  %v2652_v41 = vld [vmem:[%s2959_s5] ss:$0 sm:$0xff] }
  0x26   :  { %2031 = vmatpush3.msra.mxu0 %v2545_v6  ;;  %2062 = vmatprep.subr.mxu1 %v2470_v1 }
  0x27   :  { %2032 = vmatprep.subr.mxu0 %v2470_v1  ;;  %2063 = vmatpush3.msra.mxu1 %v2551_v7 }
  0x28   :  { %2033 = vmatpush3.msra.mxu0 %v2551_v7  ;;  %2064 = vmatprep.subr.mxu1 %v2470_v1 }
  0x29   :  { %2034 = vmatprep.subr.mxu0 %v2470_v1  ;;  %2065 = vmatpush3.msra.mxu1 %v2557_v8 }
  0x2a   :  { %2035 = vmatpush3.msra.mxu0 %v2557_v8  ;;  %2069 = vmatprep.subr.mxu1 %v2470_v1 }
  0x2b   :  { %2037 = vmatmul.mubr.f32.vlgmr.msra.gmra.mxu0 %v2470_v1  ;;  %2039 = vmatprep.subr.mxu0 %v2470_v1 }
  0x2c   :  { %2055 = vmatprep.mubr.msk.f32.mxu0 %vm2471_vm0, %v2470_v1  ;;  %2040 = vmatpush3.msra.mxu0 %v2584_v28 }
  0x2d   :  { %2041 = vmatprep.subr.mxu0 %v2470_v1 }
  0x2e   :  { %2042 = vmatpush3.msra.mxu0 %v2586_v29 }
  0x2f   :  { %2043 = vmatprep.subr.mxu0 %v2470_v1 }
  0x30   :  { %2044 = vmatpush3.msra.mxu0 %v2590_v30 }
  0x31   :  { %2045 = vmatprep.subr.mxu0 %v2470_v1 }
  0x32   :  { %2046 = vmatpush3.msra.mxu0 %v2594_v31 }
  0x33   :  { %2047 = vmatprep.subr.mxu0 %v2470_v1 }
  0x34   :  { %2048 = vmatpush3.msra.mxu0 %v2598_v32 }
  0x35   :  { %2049 = vmatprep.subr.mxu0 %v2470_v1 }
  0x36   :  { %2050 = vmatpush3.msra.mxu0 %v2602_v33 }
  0x37   :  { %2051 = vmatprep.subr.mxu0 %v2470_v1 }
  0x38   :  { %2052 = vmatpush3.msra.mxu0 %v2606_v35 }
  0x39   :  { %2053 = vmatprep.subr.mxu0 %v2470_v1 }
  0x3a   :  { %2054 = vmatpush3.msra.mxu0 %v2613_v36 }
  0x3b   :  { %2088 = vmatprep.subr.mxu0 %v2470_v1 }
  0xe2   :  { %v2027_v10 = vpop.f32.mrf.mxu0 }
  0xe3   :  { %v2574_v11 = vadd.f32 %v2027_v10, %v1887_v9 }
  0xe4   :  { %v165_v12 = vpop.f32.mrf.mxu0 }
  0xe5   :  { %v2576_v13 = vadd.f32 %v1887_v9, %v165_v12 }
  0xeb   :  { %v244_v14 = vpop.f32.mrf.mxu0 }
  0xec   :  { %v248_v15 = vadd.f32 %v244_v14, %v2576_v13 }
  0xed   :  { %v2038_v16 = vpop.f32.mrf.mxu0 }
  0xee   :  { %2277 = vtanh.f32 %v248_v15  ;;  %v249_v18 = vsub.f32 0.0, %v248_v15 }
  0xf0   :  { %v250_v19 = vmul.f32 1.442695, %v249_v18 }
  0xf2   :  { %2279 = vpow2.f32 %v250_v19 }
  0xfb   :  { %v2278_v17 = vpop.eup %2277 }
  0xfc   :  { %257 = vrot.lane.b32.xlu0 %v2278_v17, %s2472_s22 }
  0xff   :  { %v2280_v20 = vpop.eup %2279 }
 0x100   :  { %v252_v21 = vadd.f32 1.0, %v2280_v20 }
 0x102   :  { %2281 = vrcp.f32 %v252_v21 }
 0x10f   :  { %v2282_v22 = vpop.eup %2281 }
 0x110   :  { %v255_v25 = vmul.f32 0.0, %v2282_v22 }
 0x16e   :  { %v258_v23 = vpop.permute.xlu0 %257 }
 0x16f   :  { %v260_v24 = vmul.f32 %v2282_v22, %v258_v23 }
 0x171   :  { %262 = vrot.lane.b32.xlu0 %v260_v24, %s2473_s3 }
 0x1e3   :  { %v263_v26 = vpop.permute.xlu0 %262 }
 0x1e4   :  { %v2581_v27 = vadd.f32 %v263_v26, %v255_v25 }
 0x1e6   :  { %2283 = vtanh.f32 %v2581_v27  ;;  %v457_v2 = vrot.slane %v2581_v27, 6 }
 0x1f3   :  { %v2284_v34 = vpop.eup %2283 }
 0x1f4   :  { %268 = vrot.lane.b32.xlu1 %v2284_v34, %s2472_s22 }
 0x266   :  { %v269_v37 = vpop.permute.xlu1 %268 }
 0x267   :  { %v271_v38 = vmul.f32 %v2282_v22, %v269_v37 }
 0x269   :  { %273 = vrot.lane.b32.xlu1 %v271_v38, %s2473_s3 }
 0x2db   :  { %v274_v39 = vpop.permute.xlu1 %273 }
 0x2dc   :  { %v276_v40 = vsel %vm174_vm3, %v274_v39, 0.0  ;;  %2067 = vmatmul.mubr.msk.f32.vlgmr.msra.gmra.mxu1 %vm174_vm3, %v274_v39 }
 0x2dd   :  { %2056 = vmatmul.mubr.msk.f32.vlgmr.msra.gmra.mxu0 %vm277_vm4, %v276_v40  ;;  %2070 = vmatpush3.msra.mxu1 %v2584_v28 }
 0x2de   :  { %2071 = vmatprep.subr.mxu1 %v2470_v1  ;;  %2089 = vmatpush3.msra.mxu0 %v2541_v5 }
 0x2df   :  { %2072 = vmatpush3.msra.mxu1 %v2586_v29  ;;  %2090 = vmatprep.subr.mxu0 %v2470_v1 }
 0x2e0   :  { %2073 = vmatprep.subr.mxu1 %v2470_v1  ;;  %2091 = vmatpush3.msra.mxu0 %v2545_v6 }
 0x2e1   :  { %2074 = vmatpush3.msra.mxu1 %v2590_v30  ;;  %2092 = vmatprep.subr.mxu0 %v2470_v1 }
 0x2e2   :  { %2075 = vmatprep.subr.mxu1 %v2470_v1  ;;  %2093 = vmatpush3.msra.mxu0 %v2551_v7 }
 0x2e3   :  { %2076 = vmatpush3.msra.mxu1 %v2594_v31  ;;  %2094 = vmatprep.subr.mxu0 %v2470_v1 }
 0x2e4   :  { %2077 = vmatprep.subr.mxu1 %v2470_v1  ;;  %2085 = vmatprep.mubr.msk.f32.mxu1 %vm2471_vm0, %v2470_v1 }
 0x2e5   :  { %2078 = vmatpush3.msra.mxu1 %v2598_v32  ;;  %2095 = vmatpush3.msra.mxu0 %v2557_v8 }
 0x2e6   :  { %2079 = vmatprep.subr.mxu1 %v2470_v1  ;;  %2096 = vmatprep.mubr.msk.f32.mxu0 %vm2471_vm0, %v2470_v1 }
 0x2e7   :  { %2080 = vmatpush3.msra.mxu1 %v2602_v33  ;;  %2099 = vmatprep.subr.mxu0 %v2470_v1 }
 0x2e8   :  { %2081 = vmatprep.subr.mxu1 %v2470_v1 }
 0x2e9   :  { %2082 = vmatpush3.msra.mxu1 %v2606_v35 }
 0x2ea   :  { %2083 = vmatprep.subr.mxu1 %v2470_v1 }
 0x2eb   :  { %2084 = vmatpush3.msra.mxu1 %v2613_v36 }
 0x2ec   :  { %2118 = vmatprep.subr.mxu1 %v2470_v1 }
 0x39c   :  { %v442_v42 = vpop.f32.mrf.mxu1 }
 0x39d   :  { %v447_v43 = vrot.slane %v442_v42, 6  ;;  %v347_v44 = vpop.f32.mrf.mxu0 }
 0x39e   :  { %v348_v45 = vadd.f32 %v2652_v41, %v347_v44  ;;  %v2068_v46 = vpop.f32.mrf.mxu1 }
 0x39f   :  { %v449_v47 = vadd.f32 %v447_v43, %v2576_v13  ;;  %v2057_v48 = vpop.f32.mrf.mxu0 }
 0x3a0   :  { %2285 = vtanh.f32 %v348_v45  ;;  %v351_v51 = vsub.f32 0.0, %v348_v45 }
 0x3a1   :  { %2287 = vtanh.f32 %v449_v47  ;;  %v450_v52 = vsub.f32 0.0, %v449_v47 }
 0x3a2   :  { %v352_v53 = vmul.f32 1.442695, %v351_v51 }
 0x3a3   :  { %v451_v54 = vmul.f32 1.442695, %v450_v52 }
 0x3a4   :  { %2289 = vpow2.f32 %v352_v53 }
 0x3a5   :  { %2291 = vpow2.f32 %v451_v54 }
 0x3ad   :  { %v2286_v49 = vpop.eup %2285 }
 0x3ae   :  { %v2288_v50 = vpop.eup %2287  ;;  %359 = vrot.lane.b32.xlu0 %v2286_v49, %s2472_s22 }
 0x3af   :  { %461 = vrot.lane.b32.xlu1 %v2288_v50, %s2472_s22 }
 0x3b1   :  { %v2290_v55 = vpop.eup %2289 }
 0x3b2   :  { %v2292_v56 = vpop.eup %2291  ;;  %v354_v57 = vadd.f32 1.0, %v2290_v55 }
 0x3b3   :  { %v453_v58 = vadd.f32 1.0, %v2292_v56 }
 0x3b4   :  { %2293 = vrcp.f32 %v354_v57 }
 0x3b5   :  { %2295 = vrcp.f32 %v453_v58 }
 0x3c1   :  { %v2294_v59 = vpop.eup %2293 }
 0x3c2   :  { %v2296_v61 = vpop.eup %2295  ;;  %v357_v3 = vmul.f32 0.0, %v2294_v59 }
 0x3c3   :  { %v459_v9 = vmul.f32 %v2296_v61, %v457_v2 }
 0x420   :  { %v360_v60 = vpop.permute.xlu0 %359 }
 0x421   :  { %v362_v62 = vmul.f32 %v2294_v59, %v360_v60  ;;  %v462_v63 = vpop.permute.xlu1 %461 }
 0x422   :  { %v464_v0 = vmul.f32 %v2296_v61, %v462_v63 }
 0x423   :  { %364 = vrot.lane.b32.xlu0 %v362_v62, %s2473_s3 }
 0x424   :  { %466 = vrot.lane.b32.xlu1 %v464_v0, %s2473_s3 }
 0x495   :  { %v365_v4 = vpop.permute.xlu0 %364 }
 0x496   :  { %v2661_v10 = vadd.f32 %v365_v4, %v357_v3  ;;  %v467_v12 = vpop.permute.xlu1 %466 }
 0x497   :  { %v2663_v14 = vadd.f32 %v467_v12, %v459_v9 }
 0x498   :  { %2297 = vtanh.f32 %v2661_v10 }
 0x499   :  { %2299 = vtanh.f32 %v2663_v14  ;;  %v669_v60 = vrot.slane %v2663_v14, 6 }
 0x4a5   :  { %v2298_v15 = vpop.eup %2297 }
 0x4a6   :  { %v2300_v16 = vpop.eup %2299  ;;  %370 = vrot.lane.b32.xlu0 %v2298_v15, %s2472_s22 }
 0x4a7   :  { %472 = vrot.lane.b32.xlu1 %v2300_v16, %s2472_s22 }
 0x518   :  { %v371_v17 = vpop.permute.xlu0 %370 }
 0x519   :  { %v373_v18 = vmul.f32 %v2294_v59, %v371_v17  ;;  %v473_v19 = vpop.permute.xlu1 %472 }
 0x51a   :  { %v475_v20 = vmul.f32 %v2296_v61, %v473_v19 }
 0x51b   :  { %v481_v21 = vrot.slane %v373_v18, 6 }
 0x51c   :  { %477 = vrot.lane.b32.xlu0 %v475_v20, %s2473_s3  ;;  %v583_v22 = vrot.slane %v475_v20, 2 }
 0x51d   :  { %482 = vrot.lane.b32.xlu1 %v481_v21, %s2472_s22 }
 0x520   :  { %584 = vrot.lane.b32.xlu0 %v583_v22, %s2473_s3 }
 0x58e   :  { %v478_v23 = vpop.permute.xlu0 %477 }
 0x58f   :  { %v483_v24 = vpop.permute.xlu1 %482 }
 0x590   :  { %v485_v25 = vsel %vm174_vm3, %v478_v23, %v483_v24 }
 0x591   :  { %v487_v26 = vrot.slane %v485_v25, 2 }
 0x592   :  { %v585_v27 = vpop.permute.xlu0 %584 }
 0x593   :  { %2086 = vmatmul.mubr.msk.f32.vlgmr.msra.gmra.mxu1 %vm277_vm4, %v487_v26  ;;  %2097 = vmatmul.mubr.msk.f32.vlgmr.msra.gmra.mxu0 %vm174_vm3, %v585_v27 }
 0x594   :  { %2100 = vmatpush3.msra.mxu0 %v2584_v28  ;;  %2119 = vmatpush3.msra.mxu1 %v2541_v5 }
 0x595   :  { %2101 = vmatprep.subr.mxu0 %v2470_v1  ;;  %2120 = vmatprep.subr.mxu1 %v2470_v1 }
 0x596   :  { %2102 = vmatpush3.msra.mxu0 %v2586_v29  ;;  %2121 = vmatpush3.msra.mxu1 %v2545_v6 }
 0x597   :  { %2103 = vmatprep.subr.mxu0 %v2470_v1  ;;  %2122 = vmatprep.subr.mxu1 %v2470_v1 }
 0x598   :  { %2104 = vmatpush3.msra.mxu0 %v2590_v30  ;;  %2123 = vmatpush3.msra.mxu1 %v2551_v7 }
 0x599   :  { %2105 = vmatprep.subr.mxu0 %v2470_v1  ;;  %2115 = vmatprep.mubr.msk.f32.mxu0 %vm2471_vm0, %v2470_v1 }
 0x59a   :  { %2106 = vmatpush3.msra.mxu0 %v2594_v31  ;;  %2124 = vmatprep.subr.mxu1 %v2470_v1 }
 0x59b   :  { %2107 = vmatprep.subr.mxu0 %v2470_v1  ;;  %2125 = vmatpush3.msra.mxu1 %v2557_v8 }
 0x59c   :  { %2108 = vmatpush3.msra.mxu0 %v2598_v32  ;;  %2126 = vmatprep.mubr.msk.f32.mxu1 %vm2471_vm0, %v2470_v1 }
 0x59d   :  { %2109 = vmatprep.subr.mxu0 %v2470_v1  ;;  %2129 = vmatprep.subr.mxu1 %v2470_v1 }
 0x59e   :  { %2110 = vmatpush3.msra.mxu0 %v2602_v33 }
 0x59f   :  { %2111 = vmatprep.subr.mxu0 %v2470_v1 }
 0x5a0   :  { %2112 = vmatpush3.msra.mxu0 %v2606_v35 }
 0x5a1   :  { %2113 = vmatprep.subr.mxu0 %v2470_v1 }
 0x5a2   :  { %2114 = vmatpush3.msra.mxu0 %v2613_v36 }
 0x5a3   :  { %2148 = vmatprep.subr.mxu0 %v2470_v1 }
 0x653   :  { %v556_v34 = vpop.f32.mrf.mxu1  ;;  %v654_v37 = vpop.f32.mrf.mxu0 }
 0x654   :  { %v557_v38 = vadd.f32 %v2652_v41, %v556_v34  ;;  %v659_v39 = vrot.slane %v654_v37, 4 }
 0x655   :  { %v2087_v40 = vpop.f32.mrf.mxu1  ;;  %v2098_v42 = vpop.f32.mrf.mxu0 }
 0x656   :  { %2301 = vtanh.f32 %v557_v38  ;;  %v661_v43 = vadd.f32 %v659_v39, %v2576_v13  ;;  %v560_v46 = vsub.f32 0.0, %v557_v38 }
 0x658   :  { %2303 = vtanh.f32 %v661_v43  ;;  %v662_v47 = vsub.f32 0.0, %v661_v43  ;;  %v561_v48 = vmul.f32 1.442695, %v560_v46 }
 0x65a   :  { %v663_v49 = vmul.f32 1.442695, %v662_v47  ;;  %2305 = vpow2.f32 %v561_v48 }
 0x65c   :  { %2307 = vpow2.f32 %v663_v49 }
 0x663   :  { %v2302_v44 = vpop.eup %2301 }
 0x664   :  { %568 = vrot.lane.b32.xlu1 %v2302_v44, %s2472_s22 }
 0x665   :  { %v2304_v45 = vpop.eup %2303 }
 0x666   :  { %673 = vrot.lane.b32.xlu0 %v2304_v45, %s2472_s22 }
 0x667   :  { %v2306_v50 = vpop.eup %2305 }
 0x668   :  { %v563_v52 = vadd.f32 1.0, %v2306_v50 }
 0x669   :  { %v2308_v51 = vpop.eup %2307 }
 0x66a   :  { %v665_v53 = vadd.f32 1.0, %v2308_v51  ;;  %2309 = vrcp.f32 %v563_v52 }
 0x66c   :  { %2311 = vrcp.f32 %v665_v53 }
 0x677   :  { %v2310_v54 = vpop.eup %2309 }
 0x678   :  { %v566_v61 = vmul.f32 %v2310_v54, %v2661_v10 }
 0x679   :  { %v2312_v57 = vpop.eup %2311 }
 0x67a   :  { %v671_v0 = vmul.f32 %v2312_v57, %v669_v60 }
 0x6d6   :  { %v569_v55 = vpop.permute.xlu1 %568 }
 0x6d7   :  { %v571_v56 = vmul.f32 %v2310_v54, %v569_v55 }
 0x6d8   :  { %v674_v58 = vpop.permute.xlu0 %673 }
 0x6d9   :  { %v676_v59 = vmul.f32 %v2312_v57, %v674_v58  ;;  %573 = vrot.lane.b32.xlu1 %v571_v56, %s2473_s3 }
 0x6db   :  { %678 = vrot.lane.b32.xlu0 %v676_v59, %s2473_s3 }
 0x74b   :  { %v574_v62 = vpop.permute.xlu1 %573 }
 0x74c   :  { %v2711_v63 = vadd.f32 %v574_v62, %v566_v61 }
 0x74d   :  { %v679_v2 = vpop.permute.xlu0 %678 }
 0x74e   :  { %2313 = vtanh.f32 %v2711_v63  ;;  %v2714_v3 = vadd.f32 %v679_v2, %v671_v0 }
 0x750   :  { %2315 = vtanh.f32 %v2714_v3  ;;  %v881_v55 = vrot.slane %v2714_v3, 6 }
 0x75b   :  { %v2314_v4 = vpop.eup %2313 }
 0x75c   :  { %579 = vrot.lane.b32.xlu1 %v2314_v4, %s2472_s22 }
 0x75d   :  { %v2316_v9 = vpop.eup %2315 }
 0x75e   :  { %684 = vrot.lane.b32.xlu0 %v2316_v9, %s2472_s22 }
 0x7ce   :  { %v580_v12 = vpop.permute.xlu1 %579 }
 0x7cf   :  { %v582_v14 = vmul.f32 %v2310_v54, %v580_v12 }
 0x7d0   :  { %v685_v10 = vpop.permute.xlu0 %684 }
 0x7d1   :  { %v693_v15 = vrot.slane %v582_v14, 4  ;;  %v687_v16 = vmul.f32 %v2312_v57, %v685_v10 }
 0x7d3   :  { %694 = vrot.lane.b32.xlu0 %v693_v15, %s2472_s22  ;;  %689 = vrot.lane.b32.xlu1 %v687_v16, %s2473_s3  ;;  %v795_v17 = vrot.slane %v687_v16, 4 }
 0x7d7   :  { %796 = vrot.lane.b32.xlu1 %v795_v17, %s2473_s3 }
 0x845   :  { %v690_v18 = vpop.permute.xlu1 %689  ;;  %v695_v19 = vpop.permute.xlu0 %694 }
 0x846   :  { %v697_v20 = vsel %vm174_vm3, %v690_v18, %v695_v19 }
 0x847   :  { %v699_v21 = vrot.slane %v697_v20, 4 }
 0x849   :  { %v797_v22 = vpop.permute.xlu1 %796  ;;  %2116 = vmatmul.mubr.msk.f32.vlgmr.msra.gmra.mxu0 %vm277_vm4, %v699_v21 }
 0x84a   :  { %2127 = vmatmul.mubr.msk.f32.vlgmr.msra.gmra.mxu1 %vm174_vm3, %v797_v22  ;;  %2149 = vmatpush3.msra.mxu0 %v2541_v5 }
 0x84b   :  { %2130 = vmatpush3.msra.mxu1 %v2584_v28  ;;  %2150 = vmatprep.subr.mxu0 %v2470_v1 }
 0x84c   :  { %2131 = vmatprep.subr.mxu1 %v2470_v1  ;;  %2151 = vmatpush3.msra.mxu0 %v2545_v6 }
 0x84d   :  { %2132 = vmatpush3.msra.mxu1 %v2586_v29  ;;  %2152 = vmatprep.subr.mxu0 %v2470_v1 }
 0x84e   :  { %2133 = vmatprep.subr.mxu1 %v2470_v1  ;;  %2153 = vmatpush3.msra.mxu0 %v2551_v7 }
 0x84f   :  { %2134 = vmatpush3.msra.mxu1 %v2590_v30  ;;  %2145 = vmatprep.mubr.msk.f32.mxu1 %vm2471_vm0, %v2470_v1 }
 0x850   :  { %2135 = vmatprep.subr.mxu1 %v2470_v1  ;;  %2154 = vmatprep.subr.mxu0 %v2470_v1 }
 0x851   :  { %2136 = vmatpush3.msra.mxu1 %v2594_v31  ;;  %2155 = vmatpush3.msra.mxu0 %v2557_v8 }
 0x852   :  { %2137 = vmatprep.subr.mxu1 %v2470_v1  ;;  %2156 = vmatprep.mubr.msk.f32.mxu0 %vm2471_vm0, %v2470_v1 }
 0x853   :  { %2138 = vmatpush3.msra.mxu1 %v2598_v32  ;;  %2159 = vmatprep.subr.mxu0 %v2470_v1 }
 0x854   :  { %2139 = vmatprep.subr.mxu1 %v2470_v1 }
 0x855   :  { %2140 = vmatpush3.msra.mxu1 %v2602_v33 }
 0x856   :  { %2141 = vmatprep.subr.mxu1 %v2470_v1 }
 0x857   :  { %2142 = vmatpush3.msra.mxu1 %v2606_v35 }
 0x858   :  { %2143 = vmatprep.subr.mxu1 %v2470_v1 }
 0x859   :  { %2144 = vmatpush3.msra.mxu1 %v2613_v36 }
 0x85a   :  { %2178 = vmatprep.subr.mxu1 %v2470_v1 }
 0x909   :  { %v768_v23 = vpop.f32.mrf.mxu0 }
 0x90a   :  { %v769_v24 = vadd.f32 %v2652_v41, %v768_v23  ;;  %v866_v25 = vpop.f32.mrf.mxu1 }
 0x90b   :  { %v871_v26 = vrot.slane %v866_v25, 2  ;;  %v2117_v27 = vpop.f32.mrf.mxu0 }
 0x90c   :  { %2317 = vtanh.f32 %v769_v24  ;;  %v2128_v34 = vpop.f32.mrf.mxu1  ;;  %v772_v40 = vsub.f32 0.0, %v769_v24 }
 0x90d   :  { %v873_v37 = vadd.f32 %v871_v26, %v2576_v13 }
 0x90e   :  { %v773_v43 = vmul.f32 1.442695, %v772_v40 }
 0x90f   :  { %2319 = vtanh.f32 %v873_v37  ;;  %v874_v42 = vsub.f32 0.0, %v873_v37 }
 0x910   :  { %2321 = vpow2.f32 %v773_v43 }
 0x911   :  { %v875_v44 = vmul.f32 1.442695, %v874_v42 }
 0x913   :  { %2323 = vpow2.f32 %v875_v44 }
 0x919   :  { %v2318_v38 = vpop.eup %2317 }
 0x91a   :  { %780 = vrot.lane.b32.xlu0 %v2318_v38, %s2472_s22 }
 0x91c   :  { %v2320_v39 = vpop.eup %2319 }
 0x91d   :  { %885 = vrot.lane.b32.xlu1 %v2320_v39, %s2472_s22  ;;  %v2322_v45 = vpop.eup %2321 }
 0x91e   :  { %v775_v47 = vadd.f32 1.0, %v2322_v45 }
 0x920   :  { %v2324_v46 = vpop.eup %2323  ;;  %2325 = vrcp.f32 %v775_v47 }
 0x921   :  { %v877_v48 = vadd.f32 1.0, %v2324_v46 }
 0x923   :  { %2327 = vrcp.f32 %v877_v48 }
 0x92d   :  { %v2326_v13 = vpop.eup %2325 }
 0x92e   :  { %v778_v54 = vmul.f32 %v2326_v13, %v2711_v63 }
 0x930   :  { %v2328_v51 = vpop.eup %2327 }
 0x931   :  { %v883_v58 = vmul.f32 %v2328_v51, %v881_v55 }
 0x98c   :  { %v781_v49 = vpop.permute.xlu0 %780 }
 0x98d   :  { %v783_v50 = vmul.f32 %v2326_v13, %v781_v49 }
 0x98f   :  { %v886_v52 = vpop.permute.xlu1 %885  ;;  %785 = vrot.lane.b32.xlu0 %v783_v50, %s2473_s3 }
 0x990   :  { %v888_v53 = vmul.f32 %v2328_v51, %v886_v52 }
 0x992   :  { %890 = vrot.lane.b32.xlu1 %v888_v53, %s2473_s3 }
 0xa01   :  { %v786_v56 = vpop.permute.xlu0 %785 }
 0xa02   :  { %v2761_v57 = vadd.f32 %v786_v56, %v778_v54 }
 0xa04   :  { %2329 = vtanh.f32 %v2761_v57  ;;  %v891_v59 = vpop.permute.xlu1 %890 }
 0xa05   :  { %v2764_v60 = vadd.f32 %v891_v59, %v883_v58 }
 0xa07   :  { %2331 = vtanh.f32 %v2764_v60  ;;  %v1090_v48 = vrot.slane %v2764_v60, 6 }
 0xa11   :  { %v2330_v61 = vpop.eup %2329 }
 0xa12   :  { %791 = vrot.lane.b32.xlu0 %v2330_v61, %s2472_s22 }
 0xa14   :  { %v2332_v62 = vpop.eup %2331 }
 0xa15   :  { %896 = vrot.lane.b32.xlu1 %v2332_v62, %s2472_s22 }
 0xa84   :  { %v792_v63 = vpop.permute.xlu0 %791 }
 0xa85   :  { %v794_v0 = vmul.f32 %v2326_v13, %v792_v63 }
 0xa87   :  { %v905_v2 = vrot.slane %v794_v0, 2  ;;  %v897_v3 = vpop.permute.xlu1 %896 }
 0xa88   :  { %v899_v4 = vmul.f32 %v2328_v51, %v897_v3 }
 0xa89   :  { %906 = vrot.lane.b32.xlu1 %v905_v2, %s2472_s22 }
 0xa8a   :  { %901 = vrot.lane.b32.xlu0 %v899_v4, %s2473_s3  ;;  %v1007_v9 = vrot.slane %v899_v4, 6 }
 0xa8e   :  { %1008 = vrot.lane.b32.xlu0 %v1007_v9, %s2473_s3 }
 0xafb   :  { %v907_v12 = vpop.permute.xlu1 %906 }
 0xafc   :  { %v902_v14 = vpop.permute.xlu0 %901 }
 0xafd   :  { %v909_v10 = vsel %vm174_vm3, %v902_v14, %v907_v12 }
 0xafe   :  { %v911_v15 = vrot.slane %v909_v10, 6 }
 0xb00   :  { %2146 = vmatmul.mubr.msk.f32.vlgmr.msra.gmra.mxu1 %vm277_vm4, %v911_v15  ;;  %v1009_v16 = vpop.permute.xlu0 %1008 }
 0xb01   :  { %2157 = vmatmul.mubr.msk.f32.vlgmr.msra.gmra.mxu0 %vm174_vm3, %v1009_v16  ;;  %2179 = vmatpush3.msra.mxu1 %v2541_v5 }
 0xb02   :  { %2160 = vmatpush3.msra.mxu0 %v2584_v28  ;;  %2180 = vmatprep.subr.mxu1 %v2470_v1 }
 0xb03   :  { %2161 = vmatprep.subr.mxu0 %v2470_v1  ;;  %2181 = vmatpush3.msra.mxu1 %v2545_v6 }
 0xb04   :  { %2162 = vmatpush3.msra.mxu0 %v2586_v29  ;;  %2182 = vmatprep.subr.mxu1 %v2470_v1 }
 0xb05   :  { %2163 = vmatprep.subr.mxu0 %v2470_v1  ;;  %2183 = vmatpush3.msra.mxu1 %v2551_v7 }
 0xb06   :  { %2164 = vmatpush3.msra.mxu0 %v2590_v30  ;;  %2184 = vmatprep.subr.mxu1 %v2470_v1 }
 0xb07   :  { %2165 = vmatprep.subr.mxu0 %v2470_v1  ;;  %2185 = vmatpush3.msra.mxu1 %v2557_v8 }
 0xb08   :  { %2166 = vmatpush3.msra.mxu0 %v2594_v31  ;;  %2186 = vmatprep.mubr.msk.f32.mxu1 %vm2471_vm0, %v2470_v1 }
 0xb09   :  { %2167 = vmatprep.subr.mxu0 %v2470_v1  ;;  %2175 = vmatprep.mubr.msk.f32.mxu0 %vm2471_vm0, %v2470_v1 }
 0xb0a   :  { %2168 = vmatpush3.msra.mxu0 %v2598_v32  ;;  %2189 = vmatprep.subr.mxu1 %v2470_v1 }
 0xb0b   :  { %2169 = vmatprep.subr.mxu0 %v2470_v1 }
 0xb0c   :  { %2170 = vmatpush3.msra.mxu0 %v2602_v33 }
 0xb0d   :  { %2171 = vmatprep.subr.mxu0 %v2470_v1 }
 0xb0e   :  { %2172 = vmatpush3.msra.mxu0 %v2606_v35 }
 0xb0f   :  { %2173 = vmatprep.subr.mxu0 %v2470_v1 }
 0xb10   :  { %2174 = vmatpush3.msra.mxu0 %v2613_v36 }
 0xb11   :  { %2208 = vmatprep.subr.mxu0 %v2470_v1 }
 0xbc0   :  { %v980_v17 = vpop.f32.mrf.mxu1 }
 0xbc1   :  { %v981_v18 = vadd.f32 %v2652_v41, %v980_v17  ;;  %v1078_v19 = vpop.f32.mrf.mxu0 }
 0xbc2   :  { %v1082_v20 = vadd.f32 %v1078_v19, %v2574_v11  ;;  %v2147_v21 = vpop.f32.mrf.mxu1 }
 0xbc3   :  { %2333 = vtanh.f32 %v981_v18  ;;  %v2158_v22 = vpop.f32.mrf.mxu0  ;;  %v984_v25 = vsub.f32 0.0, %v981_v18 }
 0xbc4   :  { %2335 = vtanh.f32 %v1082_v20  ;;  %v1083_v26 = vsub.f32 0.0, %v1082_v20 }
 0xbc5   :  { %v985_v27 = vmul.f32 1.442695, %v984_v25 }
 0xbc6   :  { %v1084_v34 = vmul.f32 1.442695, %v1083_v26 }
 0xbc7   :  { %2337 = vpow2.f32 %v985_v27 }
 0xbc8   :  { %2339 = vpow2.f32 %v1084_v34 }
 0xbd0   :  { %v2334_v23 = vpop.eup %2333 }
 0xbd1   :  { %v2336_v24 = vpop.eup %2335  ;;  %992 = vrot.lane.b32.xlu1 %v2334_v23, %s2472_s22 }
 0xbd2   :  { %1094 = vrot.lane.b32.xlu0 %v2336_v24, %s2472_s22 }
 0xbd4   :  { %v2338_v37 = vpop.eup %2337 }
 0xbd5   :  { %v2340_v38 = vpop.eup %2339  ;;  %v987_v39 = vadd.f32 1.0, %v2338_v37 }
 0xbd6   :  { %v1086_v40 = vadd.f32 1.0, %v2340_v38 }
 0xbd7   :  { %2341 = vrcp.f32 %v987_v39 }
 0xbd8   :  { %2343 = vrcp.f32 %v1086_v40 }
 0xbe4   :  { %v2342_v42 = vpop.eup %2341 }
 0xbe5   :  { %v2344_v44 = vpop.eup %2343  ;;  %v990_v13 = vmul.f32 %v2342_v42, %v2761_v57 }
 0xbe6   :  { %v1092_v50 = vmul.f32 %v2344_v44, %v1090_v48 }
 0xc43   :  { %v993_v43 = vpop.permute.xlu1 %992 }
 0xc44   :  { %v995_v45 = vmul.f32 %v2342_v42, %v993_v43  ;;  %v1095_v46 = vpop.permute.xlu0 %1094 }
 0xc45   :  { %v1097_v47 = vmul.f32 %v2344_v44, %v1095_v46 }
 0xc46   :  { %997 = vrot.lane.b32.xlu1 %v995_v45, %s2473_s3 }
 0xc47   :  { %1099 = vrot.lane.b32.xlu0 %v1097_v47, %s2473_s3 }
 0xcb8   :  { %v998_v49 = vpop.permute.xlu1 %997 }
 0xcb9   :  { %v2811_v51 = vadd.f32 %v998_v49, %v990_v13  ;;  %v1100_v52 = vpop.permute.xlu0 %1099 }
 0xcba   :  { %v2813_v53 = vadd.f32 %v1100_v52, %v1092_v50 }
 0xcbb   :  { %2345 = vtanh.f32 %v2811_v51 }
 0xcbc   :  { %2347 = vtanh.f32 %v2813_v53  ;;  %v1297_v25 = vrot.slane %v2813_v53, 6  ;;  %v2409_v53 = vld [vmem:[#allocation3 + $0x18] sm:$0xff] }
 0xcc8   :  { %v2346_v54 = vpop.eup %2345 }
 0xcc9   :  { %v2348_v55 = vpop.eup %2347  ;;  %1003 = vrot.lane.b32.xlu1 %v2346_v54, %s2472_s22  ;;  %v2410_v54 = vld [vmem:[#allocation3 + $0x10] sm:$0xff] }
 0xcca   :  { %1105 = vrot.lane.b32.xlu0 %v2348_v55, %s2472_s22  ;;  %v2411_v55 = vld [vmem:[#allocation3 + $0x8] sm:$0xff] }
 0xd3b   :  { %v1004_v56 = vpop.permute.xlu1 %1003 }
 0xd3c   :  { %v1006_v58 = vmul.f32 %v2342_v42, %v1004_v56  ;;  %v1106_v57 = vpop.permute.xlu0 %1105 }
 0xd3d   :  { %v1108_v59 = vmul.f32 %v2344_v44, %v1106_v57 }
 0xd3e   :  { %1114 = vrot.lane.b32.xlu0 %v1006_v58, %s2472_s22 }
 0xd3f   :  { %1110 = vrot.lane.b32.xlu1 %v1108_v59, %s2473_s3 }
 0xdb0   :  { %v1115_v60 = vpop.permute.xlu0 %1114 }
 0xdb1   :  { %v1111_v61 = vpop.permute.xlu1 %1110 }
 0xdb2   :  { %v1117_v62 = vsel %vm174_vm3, %v1111_v61, %v1115_v60  ;;  %2187 = vmatmul.mubr.msk.f32.vlgmr.msra.gmra.mxu1 %vm174_vm3, %v1111_v61 }
 0xdb3   :  { %2176 = vmatmul.mubr.msk.f32.vlgmr.msra.gmra.mxu0 %vm277_vm4, %v1117_v62  ;;  %2190 = vmatpush3.msra.mxu1 %v2584_v28 }
 0xdb4   :  { %2191 = vmatprep.subr.mxu1 %v2470_v1  ;;  %2209 = vmatpush3.msra.mxu0 %v2541_v5 }
 0xdb5   :  { %2192 = vmatpush3.msra.mxu1 %v2586_v29  ;;  %2210 = vmatprep.subr.mxu0 %v2470_v1 }
 0xdb6   :  { %2193 = vmatprep.subr.mxu1 %v2470_v1  ;;  %2211 = vmatpush3.msra.mxu0 %v2545_v6 }
 0xdb7   :  { %2194 = vmatpush3.msra.mxu1 %v2590_v30  ;;  %2212 = vmatprep.subr.mxu0 %v2470_v1 }
 0xdb8   :  { %2195 = vmatprep.subr.mxu1 %v2470_v1  ;;  %2213 = vmatpush3.msra.mxu0 %v2551_v7 }
 0xdb9   :  { %2196 = vmatpush3.msra.mxu1 %v2594_v31  ;;  %2214 = vmatprep.subr.mxu0 %v2470_v1 }
 0xdba   :  { %2197 = vmatprep.subr.mxu1 %v2470_v1  ;;  %2205 = vmatprep.mubr.msk.f32.mxu1 %vm2471_vm0, %v2470_v1 }
 0xdbb   :  { %2198 = vmatpush3.msra.mxu1 %v2598_v32  ;;  %2215 = vmatpush3.msra.mxu0 %v2557_v8 }
 0xdbc   :  { %2199 = vmatprep.subr.mxu1 %v2470_v1  ;;  %2216 = vmatprep.mubr.msk.f32.mxu0 %vm2471_vm0, %v2470_v1 }
 0xdbd   :  { %2200 = vmatpush3.msra.mxu1 %v2602_v33  ;;  %2219 = vmatprep.subr.mxu0 %v2470_v1 }
 0xdbe   :  { %2201 = vmatprep.subr.mxu1 %v2470_v1 }
 0xdbf   :  { %2202 = vmatpush3.msra.mxu1 %v2606_v35 }
 0xdc0   :  { %2203 = vmatprep.subr.mxu1 %v2470_v1 }
 0xdc1   :  { %2204 = vmatpush3.msra.mxu1 %v2613_v36 }
 0xdc2   :  { %2238 = vmatprep.subr.mxu1 %v2470_v1 }
 0xe72   :  { %v1282_v5 = vpop.f32.mrf.mxu1 }
 0xe73   :  { %v1287_v6 = vrot.slane %v1282_v5, 6  ;;  %v1187_v7 = vpop.f32.mrf.mxu0 }
 0xe74   :  { %v1188_v8 = vadd.f32 %v2652_v41, %v1187_v7  ;;  %v2188_v63 = vpop.f32.mrf.mxu1 }
 0xe75   :  { %v1289_v0 = vadd.f32 %v1287_v6, %v2574_v11  ;;  %v2177_v2 = vpop.f32.mrf.mxu0 }
 0xe76   :  { %2349 = vtanh.f32 %v1188_v8  ;;  %v1191_v9 = vsub.f32 0.0, %v1188_v8 }
 0xe77   :  { %2351 = vtanh.f32 %v1289_v0  ;;  %v1290_v12 = vsub.f32 0.0, %v1289_v0 }
 0xe78   :  { %v1192_v14 = vmul.f32 1.442695, %v1191_v9 }
 0xe79   :  { %v1291_v10 = vmul.f32 1.442695, %v1290_v12 }
 0xe7a   :  { %2353 = vpow2.f32 %v1192_v14 }
 0xe7b   :  { %2355 = vpow2.f32 %v1291_v10 }
 0xe83   :  { %v2350_v3 = vpop.eup %2349 }
 0xe84   :  { %v2352_v4 = vpop.eup %2351  ;;  %1199 = vrot.lane.b32.xlu1 %v2350_v3, %s2472_s22 }
 0xe85   :  { %1301 = vrot.lane.b32.xlu0 %v2352_v4, %s2472_s22 }
 0xe87   :  { %v2354_v15 = vpop.eup %2353 }
 0xe88   :  { %v2356_v16 = vpop.eup %2355  ;;  %v1194_v17 = vadd.f32 1.0, %v2354_v15 }
 0xe89   :  { %v1293_v18 = vadd.f32 1.0, %v2356_v16 }
 0xe8a   :  { %2357 = vrcp.f32 %v1194_v17 }
 0xe8b   :  { %2359 = vrcp.f32 %v1293_v18 }
 0xe97   :  { %v2358_v19 = vpop.eup %2357 }
 0xe98   :  { %v2360_v21 = vpop.eup %2359  ;;  %v1197_v26 = vmul.f32 %v2358_v19, %v2811_v51 }
 0xe99   :  { %v1299_v34 = vmul.f32 %v2360_v21, %v1297_v25 }
 0xef6   :  { %v1200_v20 = vpop.permute.xlu1 %1199 }
 0xef7   :  { %v1202_v22 = vmul.f32 %v2358_v19, %v1200_v20  ;;  %v1302_v23 = vpop.permute.xlu0 %1301 }
 0xef8   :  { %v1304_v24 = vmul.f32 %v2360_v21, %v1302_v23 }
 0xef9   :  { %1204 = vrot.lane.b32.xlu1 %v1202_v22, %s2473_s3 }
 0xefa   :  { %1306 = vrot.lane.b32.xlu0 %v1304_v24, %s2473_s3 }
 0xf6b   :  { %v1205_v27 = vpop.permute.xlu1 %1204 }
 0xf6c   :  { %v2860_v37 = vadd.f32 %v1205_v27, %v1197_v26  ;;  %v1307_v38 = vpop.permute.xlu0 %1306 }
 0xf6d   :  { %v2862_v39 = vadd.f32 %v1307_v38, %v1299_v34  ;;  %v2413_v38 = vld [vmem:[#allocation5 + $0x38] sm:$0xff] }
 0xf6e   :  { %2361 = vtanh.f32 %v2860_v37 }
 0xf6f   :  { %2363 = vtanh.f32 %v2862_v39  ;;  %v1509_v4 = vrot.slane %v2862_v39, 6  ;;  %v2414_v39 = vld [vmem:[#allocation5 + $0x30] sm:$0xff] }
 0xf7b   :  { %v2362_v40 = vpop.eup %2361 }
 0xf7c   :  { %v2364_v42 = vpop.eup %2363  ;;  %1210 = vrot.lane.b32.xlu1 %v2362_v40, %s2472_s22  ;;  %v2415_v40 = vld [vmem:[#allocation5 + $0x28] sm:$0xff] }
 0xf7d   :  { %1312 = vrot.lane.b32.xlu0 %v2364_v42, %s2472_s22  ;;  %v2416_v42 = vld [vmem:[#allocation5 + $0x20] sm:$0xff] }
 0xfee   :  { %v1211_v43 = vpop.permute.xlu1 %1210 }
 0xfef   :  { %v1213_v44 = vmul.f32 %v2358_v19, %v1211_v43  ;;  %v1313_v45 = vpop.permute.xlu0 %1312  ;;  %v2417_v43 = vld [vmem:[#allocation5 + $0x18] sm:$0xff] }
 0xff0   :  { %v1315_v46 = vmul.f32 %v2360_v21, %v1313_v45  ;;  %v2419_v45 = vld [vmem:[#allocation5 + $0x8] sm:$0xff] }
 0xff1   :  { %v1321_v47 = vrot.slane %v1213_v44, 6  ;;  %v2418_v44 = vld [vmem:[#allocation5 + $0x10] sm:$0xff] }
 0xff2   :  { %1317 = vrot.lane.b32.xlu1 %v1315_v46, %s2473_s3  ;;  %v1423_v48 = vrot.slane %v1315_v46, 2  ;;  %v2420_v46 = vld [vmem:[#allocation5] sm:$0xff] }
 0xff3   :  { %1322 = vrot.lane.b32.xlu0 %v1321_v47, %s2472_s22 }
 0xff6   :  { %1424 = vrot.lane.b32.xlu1 %v1423_v48, %s2473_s3  ;;  %v2421_v48 = vld [vmem:[%s2959_s5] ss:$0 sm:$0xff] }
0x1064   :  { %v1318_v13 = vpop.permute.xlu1 %1317 }
0x1065   :  { %v1323_v49 = vpop.permute.xlu0 %1322 }
0x1066   :  { %v1325_v50 = vsel %vm174_vm3, %v1318_v13, %v1323_v49 }
0x1067   :  { %v1327_v51 = vrot.slane %v1325_v50, 2 }
0x1068   :  { %v1425_v52 = vpop.permute.xlu1 %1424 }
0x1069   :  { %2206 = vmatmul.mubr.msk.f32.vlgmr.msra.gmra.mxu1 %vm277_vm4, %v1327_v51  ;;  %2217 = vmatmul.mubr.msk.f32.vlgmr.msra.gmra.mxu0 %vm174_vm3, %v1425_v52 }
0x106a   :  { %2220 = vmatpush3.msra.mxu0 %v2584_v28  ;;  %2239 = vmatpush3.msra.mxu1 %v2409_v53  ;;  %v2412_v28 = vld [vmem:[#allocation3] sm:$0xff] }
0x106b   :  { %2221 = vmatprep.subr.mxu0 %v2470_v1  ;;  %2240 = vmatprep.subr.mxu1 %v2470_v1 }
0x106c   :  { %2222 = vmatpush3.msra.mxu0 %v2586_v29  ;;  %2241 = vmatpush3.msra.mxu1 %v2410_v54 }
0x106d   :  { %2223 = vmatprep.subr.mxu0 %v2470_v1  ;;  %2242 = vmatprep.subr.mxu1 %v2470_v1 }
0x106e   :  { %2224 = vmatpush3.msra.mxu0 %v2590_v30  ;;  %2243 = vmatpush3.msra.mxu1 %v2411_v55 }
0x106f   :  { %2225 = vmatprep.subr.mxu0 %v2470_v1  ;;  %2235 = vmatprep.mubr.msk.f32.mxu0 %vm2471_vm0, %v2470_v1 }
0x1070   :  { %2226 = vmatpush3.msra.mxu0 %v2594_v31  ;;  %2244 = vmatprep.subr.mxu1 %v2470_v1 }
0x1071   :  { %2227 = vmatprep.subr.mxu0 %v2470_v1  ;;  %2245 = vmatpush3.msra.mxu1 %v2412_v28 }
0x1072   :  { %2228 = vmatpush3.msra.mxu0 %v2598_v32  ;;  %2246 = vmatprep.mubr.msk.f32.mxu1 %vm2471_vm0, %v2470_v1 }
0x1073   :  { %2229 = vmatprep.subr.mxu0 %v2470_v1  ;;  %2249 = vmatprep.subr.mxu1 %v2470_v1 }
0x1074   :  { %2230 = vmatpush3.msra.mxu0 %v2602_v33 }
0x1075   :  { %2231 = vmatprep.subr.mxu0 %v2470_v1 }
0x1076   :  { %2232 = vmatpush3.msra.mxu0 %v2606_v35 }
0x1077   :  { %2233 = vmatprep.subr.mxu0 %v2470_v1 }
0x1078   :  { %2234 = vmatpush3.msra.mxu0 %v2613_v36 }
0x1129   :  { %v1396_v29 = vpop.f32.mrf.mxu1  ;;  %v1494_v30 = vpop.f32.mrf.mxu0 }
0x112a   :  { %v1397_v31 = vadd.f32 %v2652_v41, %v1396_v29  ;;  %v1499_v32 = vrot.slane %v1494_v30, 4 }
0x112b   :  { %v2207_v56 = vpop.f32.mrf.mxu1  ;;  %v2218_v58 = vpop.f32.mrf.mxu0 }
0x112c   :  { %2365 = vtanh.f32 %v1397_v31  ;;  %v1501_v57 = vadd.f32 %v1499_v32, %v2574_v11  ;;  %v1400_v35 = vsub.f32 0.0, %v1397_v31 }
0x112e   :  { %2367 = vtanh.f32 %v1501_v57  ;;  %v1502_v60 = vsub.f32 0.0, %v1501_v57  ;;  %v1401_v36 = vmul.f32 1.442695, %v1400_v35 }
0x1130   :  { %v1503_v61 = vmul.f32 1.442695, %v1502_v60  ;;  %2369 = vpow2.f32 %v1401_v36 }
0x1132   :  { %2371 = vpow2.f32 %v1503_v61 }
0x1139   :  { %v2366_v33 = vpop.eup %2365 }
0x113a   :  { %1408 = vrot.lane.b32.xlu0 %v2366_v33, %s2472_s22 }
0x113b   :  { %v2368_v59 = vpop.eup %2367 }
0x113c   :  { %1513 = vrot.lane.b32.xlu1 %v2368_v59, %s2472_s22 }
0x113d   :  { %v2370_v41 = vpop.eup %2369 }
0x113e   :  { %v1403_v5 = vadd.f32 1.0, %v2370_v41 }
0x113f   :  { %v2372_v62 = vpop.eup %2371 }
0x1140   :  { %v1505_v6 = vadd.f32 1.0, %v2372_v62  ;;  %2373 = vrcp.f32 %v1403_v5 }
0x1142   :  { %2375 = vrcp.f32 %v1505_v6 }
0x114d   :  { %v2374_v7 = vpop.eup %2373 }
0x114e   :  { %v1406_v9 = vmul.f32 %v2374_v7, %v2860_v37 }
0x114f   :  { %v2376_v0 = vpop.eup %2375 }
0x1150   :  { %v1511_v10 = vmul.f32 %v2376_v0, %v1509_v4 }
0x11ac   :  { %v1409_v8 = vpop.permute.xlu0 %1408 }
0x11ad   :  { %v1411_v63 = vmul.f32 %v2374_v7, %v1409_v8 }
0x11ae   :  { %v1514_v2 = vpop.permute.xlu1 %1513 }
0x11af   :  { %v1516_v3 = vmul.f32 %v2376_v0, %v1514_v2  ;;  %1413 = vrot.lane.b32.xlu0 %v1411_v63, %s2473_s3 }
0x11b1   :  { %1518 = vrot.lane.b32.xlu1 %v1516_v3, %s2473_s3 }
0x1221   :  { %v1414_v12 = vpop.permute.xlu0 %1413 }
0x1222   :  { %v2905_v14 = vadd.f32 %v1414_v12, %v1406_v9 }
0x1223   :  { %v1519_v15 = vpop.permute.xlu1 %1518 }
0x1224   :  { %2377 = vtanh.f32 %v2905_v14  ;;  %v2908_v16 = vadd.f32 %v1519_v15, %v1511_v10 }
0x1226   :  { %2379 = vtanh.f32 %v2908_v16  ;;  %v1721_v61 = vrot.slane %v2908_v16, 6 }
0x1231   :  { %v2378_v17 = vpop.eup %2377 }
0x1232   :  { %1419 = vrot.lane.b32.xlu0 %v2378_v17, %s2472_s22 }
0x1233   :  { %v2380_v18 = vpop.eup %2379 }
0x1234   :  { %1524 = vrot.lane.b32.xlu1 %v2380_v18, %s2472_s22 }
0x12a4   :  { %v1420_v19 = vpop.permute.xlu0 %1419 }
0x12a5   :  { %v1422_v20 = vmul.f32 %v2374_v7, %v1420_v19 }
0x12a6   :  { %v1525_v21 = vpop.permute.xlu1 %1524 }
0x12a7   :  { %v1533_v22 = vrot.slane %v1422_v20, 4  ;;  %v1527_v23 = vmul.f32 %v2376_v0, %v1525_v21 }
0x12a9   :  { %1534 = vrot.lane.b32.xlu1 %v1533_v22, %s2472_s22  ;;  %1529 = vrot.lane.b32.xlu0 %v1527_v23, %s2473_s3  ;;  %v1635_v24 = vrot.slane %v1527_v23, 4 }
0x12ad   :  { %1636 = vrot.lane.b32.xlu0 %v1635_v24, %s2473_s3 }
0x131b   :  { %v1530_v25 = vpop.permute.xlu0 %1529  ;;  %v1535_v26 = vpop.permute.xlu1 %1534 }
0x131c   :  { %v1537_v27 = vsel %vm174_vm3, %v1530_v25, %v1535_v26 }
0x131d   :  { %v1539_v34 = vrot.slane %v1537_v27, 4  ;;  %v1906_v27 = vld [vmem:[%s2960_s6] ss:$0 sm:$0xff] }
0x131f   :  { %v1637_v37 = vpop.permute.xlu0 %1636  ;;  %2236 = vmatmul.mubr.msk.f32.vlgmr.msra.gmra.mxu0 %vm277_vm4, %v1539_v34 }
0x1320   :  { %2247 = vmatmul.mubr.msk.f32.vlgmr.msra.gmra.mxu1 %vm174_vm3, %v1637_v37 }
0x1321   :  { %2250 = vmatpush3.msra.mxu1 %v2413_v38  ;;  %2265 = vmatprep.mubr.msk.f32.mxu1 %vm2471_vm0, %v2470_v1 }
0x1322   :  { %2251 = vmatprep.subr.mxu1 %v2470_v1 }
0x1323   :  { %2252 = vmatpush3.msra.mxu1 %v2414_v39 }
0x1324   :  { %2253 = vmatprep.subr.mxu1 %v2470_v1 }
0x1325   :  { %2254 = vmatpush3.msra.mxu1 %v2415_v40 }
0x1326   :  { %2255 = vmatprep.subr.mxu1 %v2470_v1 }
0x1327   :  { %2256 = vmatpush3.msra.mxu1 %v2416_v42 }
0x1328   :  { %2257 = vmatprep.subr.mxu1 %v2470_v1 }
0x1329   :  { %2258 = vmatpush3.msra.mxu1 %v2417_v43 }
0x132a   :  { %2259 = vmatprep.subr.mxu1 %v2470_v1 }
0x132b   :  { %2260 = vmatpush3.msra.mxu1 %v2418_v44 }
0x132c   :  { %2261 = vmatprep.subr.mxu1 %v2470_v1 }
0x132d   :  { %2262 = vmatpush3.msra.mxu1 %v2419_v45 }
0x132e   :  { %2263 = vmatprep.subr.mxu1 %v2470_v1 }
0x132f   :  { %2264 = vmatpush3.msra.mxu1 %v2420_v46 }
0x13df   :  { %v1608_v47 = vpop.f32.mrf.mxu0 }
0x13e0   :  { %v1609_v13 = vadd.f32 %v2421_v48, %v1608_v47  ;;  %v1706_v49 = vpop.f32.mrf.mxu1  ;;  %v1907_v47 = vld [vmem:[#allocation2] ss:$0 sm:$0xff] }
0x13e1   :  { %v1711_v50 = vrot.slane %v1706_v49, 2  ;;  %v2237_v51 = vpop.f32.mrf.mxu0 }
0x13e2   :  { %2381 = vtanh.f32 %v1609_v13  ;;  %v2248_v52 = vpop.f32.mrf.mxu1  ;;  %v1612_v55 = vsub.f32 0.0, %v1609_v13 }
0x13e3   :  { %v1713_v53 = vadd.f32 %v1711_v50, %v2574_v11 }
0x13e4   :  { %v1613_v29 = vmul.f32 1.442695, %v1612_v55 }
0x13e5   :  { %2383 = vtanh.f32 %v1713_v53  ;;  %v1714_v28 = vsub.f32 0.0, %v1713_v53 }
0x13e6   :  { %2385 = vpow2.f32 %v1613_v29 }
0x13e7   :  { %v1715_v30 = vmul.f32 1.442695, %v1714_v28 }
0x13e9   :  { %2387 = vpow2.f32 %v1715_v30 }
0x13ef   :  { %v2382_v54 = vpop.eup %2381 }
0x13f0   :  { %1620 = vrot.lane.b32.xlu1 %v2382_v54, %s2472_s22 }
0x13f2   :  { %v2384_v1 = vpop.eup %2383 }
0x13f3   :  { %1725 = vrot.lane.b32.xlu0 %v2384_v1, %s2472_s22  ;;  %v2386_v31 = vpop.eup %2385 }
0x13f4   :  { %v1615_v56 = vadd.f32 1.0, %v2386_v31 }
0x13f6   :  { %v2388_v32 = vpop.eup %2387  ;;  %2389 = vrcp.f32 %v1615_v56 }
0x13f7   :  { %v1717_v58 = vadd.f32 1.0, %v2388_v32 }
0x13f9   :  { %2391 = vrcp.f32 %v1717_v58 }
0x1403   :  { %v2390_v11 = vpop.eup %2389 }
0x1404   :  { %v1618_v36 = vmul.f32 %v2390_v11, %v2905_v14 }
0x1406   :  { %v2392_v59 = vpop.eup %2391 }
0x1407   :  { %v1723_v5 = vmul.f32 %v2392_v59, %v1721_v61 }
0x1462   :  { %v1621_v57 = vpop.permute.xlu1 %1620 }
0x1463   :  { %v1623_v33 = vmul.f32 %v2390_v11, %v1621_v57 }
0x1465   :  { %v1726_v35 = vpop.permute.xlu0 %1725  ;;  %1625 = vrot.lane.b32.xlu1 %v1623_v33, %s2473_s3 }
0x1466   :  { %v1728_v60 = vmul.f32 %v2392_v59, %v1726_v35 }
0x1468   :  { %1730 = vrot.lane.b32.xlu0 %v1728_v60, %s2473_s3 }
0x14d7   :  { %v1626_v41 = vpop.permute.xlu1 %1625 }
0x14d8   :  { %v1628_v62 = vadd.f32 %v1626_v41, %v1618_v36 }
0x14da   :  { %2393 = vtanh.f32 %v1628_v62  ;;  %v1731_v6 = vpop.permute.xlu0 %1730 }
0x14db   :  { %v1733_v7 = vadd.f32 %v1731_v6, %v1723_v5 }
0x14dd   :  { %2395 = vtanh.f32 %v1733_v7 }
0x14e7   :  { %v2394_v8 = vpop.eup %2393 }
0x14e8   :  { %1631 = vrot.lane.b32.xlu1 %v2394_v8, %s2472_s22 }
0x14ea   :  { %v2396_v63 = vpop.eup %2395 }
0x14eb   :  { %1736 = vrot.lane.b32.xlu0 %v2396_v63, %s2472_s22 }
0x155a   :  { %v1632_v0 = vpop.permute.xlu1 %1631 }
0x155b   :  { %v1634_v2 = vmul.f32 %v2390_v11, %v1632_v0 }
0x155d   :  { %v1745_v3 = vrot.slane %v1634_v2, 2  ;;  %v1737_v4 = vpop.permute.xlu0 %1736 }
0x155e   :  { %v1739_v9 = vmul.f32 %v2392_v59, %v1737_v4 }
0x155f   :  { %1746 = vrot.lane.b32.xlu0 %v1745_v3, %s2472_s22 }
0x1560   :  { %1741 = vrot.lane.b32.xlu1 %v1739_v9, %s2473_s3 }
0x15d1   :  { %v1747_v12 = vpop.permute.xlu0 %1746 }
0x15d2   :  { %v1742_v14 = vpop.permute.xlu1 %1741 }
0x15d3   :  { %v1749_v10 = vsel %vm174_vm3, %v1742_v14, %v1747_v12 }
0x15d4   :  { %v1751_v15 = vrot.slane %v1749_v10, 6 }
0x15d6   :  { %2266 = vmatmul.mubr.msk.f32.vlgmr.msra.gmra.mxu1 %vm277_vm4, %v1751_v15 }
0x1696   :  { %v1820_v16 = vpop.f32.mrf.mxu1 }
0x1697   :  { %v1821_v17 = vadd.f32 %v2421_v48, %v1820_v16 }
0x1698   :  { %v2267_v18 = vpop.f32.mrf.mxu1 }
0x1699   :  { %2397 = vtanh.f32 %v1821_v17  ;;  %v1824_v20 = vsub.f32 0.0, %v1821_v17 }
0x169b   :  { %v1825_v21 = vmul.f32 1.442695, %v1824_v20 }
0x169d   :  { %2399 = vpow2.f32 %v1825_v21 }
0x16a6   :  { %v2398_v19 = vpop.eup %2397 }
0x16a7   :  { %1832 = vrot.lane.b32.xlu1 %v2398_v19, %s2472_s22 }
0x16aa   :  { %v2400_v22 = vpop.eup %2399 }
0x16ab   :  { %v1827_v23 = vadd.f32 1.0, %v2400_v22 }
0x16ad   :  { %2401 = vrcp.f32 %v1827_v23 }
0x16ba   :  { %v2402_v24 = vpop.eup %2401 }
0x16bb   :  { %v1830_v34 = vmul.f32 %v2402_v24, %v1628_v62 }
0x1719   :  { %v1833_v25 = vpop.permute.xlu1 %1832 }
0x171a   :  { %v1835_v26 = vmul.f32 %v2402_v24, %v1833_v25 }
0x171c   :  { %1837 = vrot.lane.b32.xlu0 %v1835_v26, %s2473_s3 }
0x1720   :  { %1853 = vrot.lane.b32.xlu0 %v1906_v27, %s2474_s28 }
0x178e   :  { %v1838_v37 = vpop.permute.xlu0 %1837 }
0x178f   :  { %v1840_v38 = vadd.f32 %v1838_v37, %v1830_v34 }
0x1791   :  { %2403 = vtanh.f32 %v1840_v38 }
0x1792   :  { %v1854_v42 = vpop.permute.xlu0 %1853 }
0x179e   :  { %v2404_v39 = vpop.eup %2403 }
0x179f   :  { %1843 = vrot.lane.b32.xlu1 %v2404_v39, %s2472_s22 }
0x1811   :  { %v1844_v40 = vpop.permute.xlu1 %1843 }
0x1812   :  { %v1846_v43 = vmul.f32 %v2402_v24, %v1844_v40 }
0x1814   :  { %v1856_v44 = vmul.f32 %v1854_v42, %v1846_v43 }
0x1816   :  { %1858 = vrot.lane.b32.xlu1 %v1856_v44, %s2473_s3 }
0x1888   :  { %v1859_v45 = vpop.permute.xlu1 %1858 }
0x1889   :  { %v1862_v46 = vsel %vm1861_vm5, %v1859_v45, 0.0 }
0x188a   :  { %1863 = vadd.xlane.f32.xlu0 %v1862_v46 }
0x1913   :  { %v1864_v48 = vpop.xlane.xlu0 %1863 }
0x1914   :  { %v1872_v13 = vadd.f32 %v1907_v47, %v1864_v48 }
0x1916   :  { %v1873_v49 = vsub.f32 0.0, %v1872_v13 }
0x1918   :  { %v1874_v50 = vmul.f32 1.442695, %v1873_v49 }
0x191a   :  { %2405 = vpow2.f32 %v1874_v50 }
0x1927   :  { %v2406_v51 = vpop.eup %2405 }
0x1928   :  { %v1876_v52 = vadd.f32 1.0, %v2406_v51 }
0x192a   :  { %2407 = vrcp.f32 %v1876_v52 }
0x1937   :  { %v2408_v53 = vpop.eup %2407 }
0x1938   :  { %1879 = vst.msk [vmem:[%s2962_s8] sm:$0x3] %vm1878_vm6, %v2408_v53 }
0x1939   :  { %1884 = vsyncpa [#allocation4], 1 }
0x193a   :  { %1885 = vsyncpa [#allocation6], 1 }

</bundles_post_ra>
